<compile_context>
chip_gen: v7x
topology: tpu7x:2x2x1
jax: 0.10.0
libtpu: 0.0.40
codegen_flags: <defaults>
</compile_context>

<pallas_src>
import functools

import jax
import jax.numpy as jnp
from jax.experimental import pallas as pl
from jax.experimental.pallas import tpu as pltpu


# ----------------------------------------------------------------------------
# Fused Pallas kernel
# ----------------------------------------------------------------------------
def _gte_fused_kernel(x_ref, w1_ref, b1_ref, w2_ref, b2_ref,
                      gcn_w_ref, gcn_b_ref, adj_ref, o_ref,
                      *, K, num_levels, N, L, BB, mxu_dtype):
    """Whole GraphTemporalEmbedding forward for one chunk of BB batch elements.

    x_ref    : (BB, N, L)                  input block
    w1_ref   : (num_levels, N, K*N)        conv1 weights, taps concatenated
    b1_ref   : (num_levels, N, 1)
    w2_ref   : (num_levels, N, K*N)
    b2_ref   : (num_levels, N, 1)
    gcn_w_ref: (L, L)
    gcn_b_ref: (1, BB*L)                   pre-tiled across the batch lanes
    adj_ref  : (max(num_levels-1,1), N, N) pre-normalized gumbel adjacencies
    o_ref    : (1, N, BB*L)                lane-dense output block
    """
    f32 = jnp.float32

    def mm(a, b):
        # MXU dot with f32 accumulation; operands optionally cast to bf16.
        return jnp.dot(a.astype(mxu_dtype), b.astype(mxu_dtype),
                       preferred_element_type=f32)

    # Lane-concatenate the BB batch elements: (BB, N, L) -> (N, BB*L).
    h = jnp.concatenate([x_ref[b].astype(f32) for b in range(BB)], axis=1)

    def conv_same(h, w_cat, bias, d):
        """'same' dilated conv over time as a single lane-batched MXU matmul.

        Builds X_stacked (K*N, BB*L) purely as values (static slices + zero
        edges) -- no VMEM scratch round-trip -- then W_cat (N, K*N) @ X_stacked.
        """
        pad = (K - 1) * d // 2
        cols = []
        for b in range(BB):
            hb = h[:, b * L:(b + 1) * L]                       # (N, L)
            taps = []
            for k in range(K):
                s = k * d - pad                                # tap shift
                if s < 0:
                    t = jnp.concatenate(
                        [jnp.zeros((N, -s), f32), hb[:, :L + s]], axis=1)
                elif s > 0:
                    t = jnp.concatenate(
                        [hb[:, s:], jnp.zeros((N, s), f32)], axis=1)
                else:
                    t = hb
                taps.append(t)
            cols.append(jnp.concatenate(taps, axis=0))         # (K*N, L)
        x_stk = jnp.concatenate(cols, axis=1)                  # (K*N, BB*L)
        return mm(w_cat, x_stk) + bias

    gcn_w = gcn_w_ref[...]                                     # (L, L)
    gcn_b = gcn_b_ref[...]                                     # (1, BB*L)

    for lvl in range(num_levels):
        d = 2 ** lvl
        w1_l, b1_l = w1_ref[lvl], b1_ref[lvl]                  # read per level
        w2_l, b2_l = w2_ref[lvl], b2_ref[lvl]
        # TemporalBlock: conv1+relu (dropout no-op), conv2+relu, +res, relu.
        t = jnp.maximum(conv_same(h, w1_l, b1_l, d), 0.0)
        t = jnp.maximum(conv_same(t, w2_l, b2_l, d), 0.0)
        h = jnp.maximum(t + h, 0.0)
        # AdaGCNConv after every level except the first.
        if lvl >= 1:
            # x @ W (contraction over time): sublane-stack batch -> (BB*N, L).
            h_rows = jnp.concatenate(
                [h[:, b * L:(b + 1) * L] for b in range(BB)], axis=0)
            xw_rows = mm(h_rows, gcn_w)                        # (BB*N, L)
            # back to lane-concat so a single adj (N,N) matmul covers the batch
            xw = jnp.concatenate(
                [xw_rows[b * N:(b + 1) * N, :] for b in range(BB)], axis=1)
            h = mm(adj_ref[lvl - 1], xw) + gcn_b               # (N, BB*L)

    o_ref[0] = h.astype(o_ref.dtype)                           # lane-dense store


# ----------------------------------------------------------------------------
# Host-side glue: gumbel sampling, params, forward wrapper
# ----------------------------------------------------------------------------
def gumbel_softmax_hard(key, logits, tau=1.0):
    """Forward value of F.gumbel_softmax(logits, hard=True)."""
    g = jax.random.gumbel(key, logits.shape, logits.dtype)
    y = (logits + g) / tau
    idx = jnp.argmax(y, axis=-1)
    return jax.nn.one_hot(idx, logits.shape[-1], dtype=logits.dtype)


def build_adjacencies(key, logits, num_levels, num_nodes):
    """Per-level gumbel-masked, gcn_norm'ed dense adjacencies (one per GCN call)."""
    n_adj = max(num_levels - 1, 1)
    keys = jax.random.split(key, n_adj)

    def one(k):
        z = gumbel_softmax_hard(k, logits)
        # gcn_norm of the fully connected N x N graph (add_self_loops=False):
        # every edge weight = 1/N (normalization happens BEFORE the gumbel
        # mask, matching the reference).  Edge e = i*N + j (source j ->
        # target i), 'add' aggregation  =>  A[i, j] = z[e, 0] / N.
        return z[:, 0].reshape(num_nodes, num_nodes) / float(num_nodes)

    return jax.vmap(one)(keys)                                 # (n_adj, N, N)


def init_params(key, num_nodes, seq_len, num_levels, kernel_size):
    N, L, K = num_nodes, seq_len, kernel_size
    keys = jax.random.split(key, num_levels + 1)
    w1, b1, w2, b2 = [], [], [], []
    for i in range(num_levels):
        k1, k2 = jax.random.split(keys[i], 2)
        # Conv1d weight (C_out, C_in, K); pre-concatenate taps -> (C_out, K*C_in)
        wa = 0.1 * jax.random.normal(k1, (N, N, K), jnp.float32)
        wb = 0.1 * jax.random.normal(k2, (N, N, K), jnp.float32)
        w1.append(jnp.concatenate([wa[:, :, k] for k in range(K)], axis=1))
        w2.append(jnp.concatenate([wb[:, :, k] for k in range(K)], axis=1))
        b1.append(jnp.zeros((N, 1), jnp.float32))
        b2.append(jnp.zeros((N, 1), jnp.float32))
    params = {"w1": jnp.stack(w1), "b1": jnp.stack(b1),
              "w2": jnp.stack(w2), "b2": jnp.stack(b2)}
    # AdaGCNConv: glorot weight (seq_len, seq_len), zero bias, logits init 'all'.
    limit = float(jnp.sqrt(6.0 / (L + L)))
    params["gcn_w"] = jax.random.uniform(keys[-1], (L, L), jnp.float32,
                                         -limit, limit)
    params["gcn_b"] = jnp.zeros((1, L), jnp.float32)
    params["logits"] = jnp.concatenate(
        [0.8 * jnp.ones((N * N, 1), jnp.float32),
         jnp.zeros((N * N, 1), jnp.float32)], axis=1)
    return params


def _pick_bb(B, L, bb=None):
    """Smallest divisor of B whose block width bb*L is lane-dense (>=128)."""
    if bb is not None:
        assert B % bb == 0
        return bb
    divs = [d for d in range(1, B + 1) if B % d == 0]
    for d in divs:
        if d * L >= 128:
            return d                       # lane-dense + maximal grid depth
    cands = [d for d in divs if B // d >= 2] or divs
    return cands[-1]                       # fallback: keep >=2 grid steps


def graph_temporal_embedding_forward(x, params, gumbel_key, *, num_levels,
                                     kernel_size, bb=None,
                                     mxu_dtype=jnp.float32):
    """x: (B, seq_len, num_nodes) -> (B, seq_len, num_nodes)."""
    B, L, N = x.shape
    K = kernel_size
    assert (K - 1) * (2 ** (num_levels - 1)) // 2 < L
    bb = _pick_bb(B, L, bb)
    G = B // bb

    x_bnl = jnp.transpose(x, (0, 2, 1))                        # (B, N, L)
    adj = build_adjacencies(gumbel_key, params["logits"], num_levels, N)
    n_adj = adj.shape[0]
    KN = K * N
    gcn_b_tiled = jnp.tile(params["gcn_b"], (1, bb))           # (1, bb*L)

    kern = functools.partial(_gte_fused_kernel, K=K, num_levels=num_levels,
                             N=N, L=L, BB=bb, mxu_dtype=mxu_dtype)
    out = pl.pallas_call(
        kern,
        out_shape=jax.ShapeDtypeStruct((G, N, bb * L), x.dtype),
        grid=(G,),
        in_specs=[
            pl.BlockSpec((bb, N, L), lambda g: (g, 0, 0)),
            pl.BlockSpec((num_levels, N, KN), lambda g: (0, 0, 0)),
            pl.BlockSpec((num_levels, N, 1), lambda g: (0, 0, 0)),
            pl.BlockSpec((num_levels, N, KN), lambda g: (0, 0, 0)),
            pl.BlockSpec((num_levels, N, 1), lambda g: (0, 0, 0)),
            pl.BlockSpec((L, L), lambda g: (0, 0)),
            pl.BlockSpec((1, bb * L), lambda g: (0, 0)),
            pl.BlockSpec((n_adj, N, N), lambda g: (0, 0, 0)),
        ],
        out_specs=pl.BlockSpec((1, N, bb * L), lambda g: (g, 0, 0)),
        compiler_params=pltpu.CompilerParams(
            dimension_semantics=("parallel",)),
    )(x_bnl, params["w1"], params["b1"], params["w2"], params["b2"],
      params["gcn_w"], gcn_b_tiled, adj)

    # (G, N, bb*L) lane-dense slab -> (B, L, N) module output layout.
    out = out.reshape(G, N, bb, L)
    out = jnp.transpose(out, (0, 2, 3, 1)).reshape(B, L, N)
    return out


# ----------------------------------------------------------------------------
if __name__ == "__main__":
    batch = 16
    num_nodes = 8
    seq_len = 32
    num_levels = 3
    kernel_size = 3

    root = jax.random.PRNGKey(0)
    k_param, k_input, k_gumbel = jax.random.split(root, 3)

    params = init_params(k_param, num_nodes, seq_len, num_levels, kernel_size)
    x = jax.random.normal(k_input, (batch, seq_len, num_nodes), jnp.float32)

    fwd = jax.jit(functools.partial(graph_temporal_embedding_forward,
                                    num_levels=num_levels,
                                    kernel_size=kernel_size))
    out = jax.block_until_ready(fwd(x, params, k_gumbel))

    assert out.shape == (batch, seq_len, num_nodes), out.shape
    assert bool(jnp.isfinite(out).all())
    print("KERNEL_OK")
</pallas_src>

<mosaic_0001>
module attributes {stable_mosaic.version = 11 : i64} {
  func.func @_gte_fused_kernel(%arg0: i32, %arg1: memref<4x8x32xf32, #tpu.memory_space<vmem>>, %arg2: memref<3x8x24xf32, #tpu.memory_space<vmem>>, %arg3: memref<3x8x1xf32, #tpu.memory_space<vmem>>, %arg4: memref<3x8x24xf32, #tpu.memory_space<vmem>>, %arg5: memref<3x8x1xf32, #tpu.memory_space<vmem>>, %arg6: memref<32x32xf32, #tpu.memory_space<vmem>>, %arg7: memref<1x128xf32, #tpu.memory_space<vmem>>, %arg8: memref<2x8x8xf32, #tpu.memory_space<vmem>>, %arg9: memref<1x8x128xf32, #tpu.memory_space<vmem>>) attributes {dimension_semantics = [#tpu.dimension_semantics<parallel>], iteration_bounds = array<i64: 4>, scalar_prefetch = 0 : i64, scratch_operands = 0 : i64, tpu.core_type = #tpu.core_type<tc>, window_params = [{transform_indices = @transform_0, window_bounds = array<i64: 4, 8, 32>}, {pipeline_mode = #tpu.pipeline_mode<synchronous>, transform_indices = @transform_1, window_bounds = array<i64: 3, 8, 24>}, {pipeline_mode = #tpu.pipeline_mode<synchronous>, transform_indices = @transform_2, window_bounds = array<i64: 3, 8, 1>}, {pipeline_mode = #tpu.pipeline_mode<synchronous>, transform_indices = @transform_3, window_bounds = array<i64: 3, 8, 24>}, {pipeline_mode = #tpu.pipeline_mode<synchronous>, transform_indices = @transform_4, window_bounds = array<i64: 3, 8, 1>}, {pipeline_mode = #tpu.pipeline_mode<synchronous>, transform_indices = @transform_5, window_bounds = array<i64: 32, 32>}, {pipeline_mode = #tpu.pipeline_mode<synchronous>, transform_indices = @transform_6, window_bounds = array<i64: 1, 128>}, {pipeline_mode = #tpu.pipeline_mode<synchronous>, transform_indices = @transform_7, window_bounds = array<i64: 2, 8, 8>}, {transform_indices = @transform_8, window_bounds = array<i64: 1, 8, 128>}]} {
    %c0 = arith.constant 0 : index
    %c0_0 = arith.constant 0 : index
    %c0_1 = arith.constant 0 : index
    %0 = vector.load %arg1[%c0, %c0_0, %c0_1] : memref<4x8x32xf32, #tpu.memory_space<vmem>>, vector<1x8x32xf32>
    %1 = vector.shape_cast %0 : vector<1x8x32xf32> to vector<8x32xf32>
    %c1 = arith.constant 1 : index
    %c0_2 = arith.constant 0 : index
    %c0_3 = arith.constant 0 : index
    %2 = vector.load %arg1[%c1, %c0_2, %c0_3] : memref<4x8x32xf32, #tpu.memory_space<vmem>>, vector<1x8x32xf32>
    %3 = vector.shape_cast %2 : vector<1x8x32xf32> to vector<8x32xf32>
    %c2 = arith.constant 2 : index
    %c0_4 = arith.constant 0 : index
    %c0_5 = arith.constant 0 : index
    %4 = vector.load %arg1[%c2, %c0_4, %c0_5] : memref<4x8x32xf32, #tpu.memory_space<vmem>>, vector<1x8x32xf32>
    %5 = vector.shape_cast %4 : vector<1x8x32xf32> to vector<8x32xf32>
    %c3 = arith.constant 3 : index
    %c0_6 = arith.constant 0 : index
    %c0_7 = arith.constant 0 : index
    %6 = vector.load %arg1[%c3, %c0_6, %c0_7] : memref<4x8x32xf32, #tpu.memory_space<vmem>>, vector<1x8x32xf32>
    %7 = vector.shape_cast %6 : vector<1x8x32xf32> to vector<8x32xf32>
    %8 = tpu.concatenate %1, %3, %5, %7 in 1 : vector<8x32xf32>, vector<8x32xf32>, vector<8x32xf32>, vector<8x32xf32> -> vector<8x128xf32>
    %c0_8 = arith.constant 0 : index
    %c0_9 = arith.constant 0 : index
    %9 = vector.load %arg6[%c0_8, %c0_9] : memref<32x32xf32, #tpu.memory_space<vmem>>, vector<32x32xf32>
    %c0_10 = arith.constant 0 : index
    %c0_11 = arith.constant 0 : index
    %10 = vector.load %arg7[%c0_10, %c0_11] : memref<1x128xf32, #tpu.memory_space<vmem>>, vector<1x128xf32>
    %c0_12 = arith.constant 0 : index
    %c0_13 = arith.constant 0 : index
    %c0_14 = arith.constant 0 : index
    %11 = vector.load %arg2[%c0_12, %c0_13, %c0_14] : memref<3x8x24xf32, #tpu.memory_space<vmem>>, vector<1x8x24xf32>
    %12 = vector.shape_cast %11 : vector<1x8x24xf32> to vector<8x24xf32>
    %c0_15 = arith.constant 0 : index
    %c0_16 = arith.constant 0 : index
    %c0_17 = arith.constant 0 : index
    %13 = vector.load %arg3[%c0_15, %c0_16, %c0_17] : memref<3x8x1xf32, #tpu.memory_space<vmem>>, vector<1x8x1xf32>
    %14 = vector.shape_cast %13 : vector<1x8x1xf32> to vector<8x1xf32>
    %c0_18 = arith.constant 0 : index
    %c0_19 = arith.constant 0 : index
    %c0_20 = arith.constant 0 : index
    %15 = vector.load %arg4[%c0_18, %c0_19, %c0_20] : memref<3x8x24xf32, #tpu.memory_space<vmem>>, vector<1x8x24xf32>
    %16 = vector.shape_cast %15 : vector<1x8x24xf32> to vector<8x24xf32>
    %c0_21 = arith.constant 0 : index
    %c0_22 = arith.constant 0 : index
    %c0_23 = arith.constant 0 : index
    %17 = vector.load %arg5[%c0_21, %c0_22, %c0_23] : memref<3x8x1xf32, #tpu.memory_space<vmem>>, vector<1x8x1xf32>
    %18 = vector.shape_cast %17 : vector<1x8x1xf32> to vector<8x1xf32>
    %19 = vector.extract_strided_slice %8 {offsets = [0, 0], sizes = [8, 32], strides = [1, 1]} : vector<8x128xf32> to vector<8x32xf32>
    %cst = arith.constant 0.000000e+00 : f32
    %20 = vector.broadcast %cst : f32 to vector<8x1xf32>
    %21 = vector.extract_strided_slice %19 {offsets = [0, 0], sizes = [8, 31], strides = [1, 1]} : vector<8x32xf32> to vector<8x31xf32>
    %22 = tpu.concatenate %20, %21 in 1 : vector<8x1xf32>, vector<8x31xf32> -> vector<8x32xf32>
    %23 = vector.extract_strided_slice %19 {offsets = [0, 1], sizes = [8, 31], strides = [1, 1]} : vector<8x32xf32> to vector<8x31xf32>
    %cst_24 = arith.constant 0.000000e+00 : f32
    %24 = vector.broadcast %cst_24 : f32 to vector<8x1xf32>
    %25 = tpu.concatenate %23, %24 in 1 : vector<8x31xf32>, vector<8x1xf32> -> vector<8x32xf32>
    %26 = tpu.concatenate %22, %19, %25 in 0 : vector<8x32xf32>, vector<8x32xf32>, vector<8x32xf32> -> vector<24x32xf32>
    %27 = vector.extract_strided_slice %8 {offsets = [0, 32], sizes = [8, 32], strides = [1, 1]} : vector<8x128xf32> to vector<8x32xf32>
    %cst_25 = arith.constant 0.000000e+00 : f32
    %28 = vector.broadcast %cst_25 : f32 to vector<8x1xf32>
    %29 = vector.extract_strided_slice %27 {offsets = [0, 0], sizes = [8, 31], strides = [1, 1]} : vector<8x32xf32> to vector<8x31xf32>
    %30 = tpu.concatenate %28, %29 in 1 : vector<8x1xf32>, vector<8x31xf32> -> vector<8x32xf32>
    %31 = vector.extract_strided_slice %27 {offsets = [0, 1], sizes = [8, 31], strides = [1, 1]} : vector<8x32xf32> to vector<8x31xf32>
    %cst_26 = arith.constant 0.000000e+00 : f32
    %32 = vector.broadcast %cst_26 : f32 to vector<8x1xf32>
    %33 = tpu.concatenate %31, %32 in 1 : vector<8x31xf32>, vector<8x1xf32> -> vector<8x32xf32>
    %34 = tpu.concatenate %30, %27, %33 in 0 : vector<8x32xf32>, vector<8x32xf32>, vector<8x32xf32> -> vector<24x32xf32>
    %35 = vector.extract_strided_slice %8 {offsets = [0, 64], sizes = [8, 32], strides = [1, 1]} : vector<8x128xf32> to vector<8x32xf32>
    %cst_27 = arith.constant 0.000000e+00 : f32
    %36 = vector.broadcast %cst_27 : f32 to vector<8x1xf32>
    %37 = vector.extract_strided_slice %35 {offsets = [0, 0], sizes = [8, 31], strides = [1, 1]} : vector<8x32xf32> to vector<8x31xf32>
    %38 = tpu.concatenate %36, %37 in 1 : vector<8x1xf32>, vector<8x31xf32> -> vector<8x32xf32>
    %39 = vector.extract_strided_slice %35 {offsets = [0, 1], sizes = [8, 31], strides = [1, 1]} : vector<8x32xf32> to vector<8x31xf32>
    %cst_28 = arith.constant 0.000000e+00 : f32
    %40 = vector.broadcast %cst_28 : f32 to vector<8x1xf32>
    %41 = tpu.concatenate %39, %40 in 1 : vector<8x31xf32>, vector<8x1xf32> -> vector<8x32xf32>
    %42 = tpu.concatenate %38, %35, %41 in 0 : vector<8x32xf32>, vector<8x32xf32>, vector<8x32xf32> -> vector<24x32xf32>
    %43 = vector.extract_strided_slice %8 {offsets = [0, 96], sizes = [8, 32], strides = [1, 1]} : vector<8x128xf32> to vector<8x32xf32>
    %cst_29 = arith.constant 0.000000e+00 : f32
    %44 = vector.broadcast %cst_29 : f32 to vector<8x1xf32>
    %45 = vector.extract_strided_slice %43 {offsets = [0, 0], sizes = [8, 31], strides = [1, 1]} : vector<8x32xf32> to vector<8x31xf32>
    %46 = tpu.concatenate %44, %45 in 1 : vector<8x1xf32>, vector<8x31xf32> -> vector<8x32xf32>
    %47 = vector.extract_strided_slice %43 {offsets = [0, 1], sizes = [8, 31], strides = [1, 1]} : vector<8x32xf32> to vector<8x31xf32>
    %cst_30 = arith.constant 0.000000e+00 : f32
    %48 = vector.broadcast %cst_30 : f32 to vector<8x1xf32>
    %49 = tpu.concatenate %47, %48 in 1 : vector<8x31xf32>, vector<8x1xf32> -> vector<8x32xf32>
    %50 = tpu.concatenate %46, %43, %49 in 0 : vector<8x32xf32>, vector<8x32xf32>, vector<8x32xf32> -> vector<24x32xf32>
    %51 = tpu.concatenate %26, %34, %42, %50 in 1 : vector<24x32xf32>, vector<24x32xf32>, vector<24x32xf32>, vector<24x32xf32> -> vector<24x128xf32>
    %cst_31 = arith.constant dense<0.000000e+00> : vector<8x128xf32>
    %52 = tpu.matmul %12, %51, %cst_31 {dimension_numbers = #tpu.dot_dimension_numbers<[1], [0], [0], [1], [0, 0, 1, 1], [], []>} : vector<8x24xf32>, vector<24x128xf32>, vector<8x128xf32> -> vector<8x128xf32>
    %53 = vector.broadcast %14 : vector<8x1xf32> to vector<8x128xf32>
    %54 = arith.addf %52, %53 : vector<8x128xf32>
    %cst_32 = arith.constant 0.000000e+00 : f32
    %55 = vector.broadcast %cst_32 : f32 to vector<8x128xf32>
    %56 = arith.maximumf %54, %55 : vector<8x128xf32>
    %57 = vector.extract_strided_slice %56 {offsets = [0, 0], sizes = [8, 32], strides = [1, 1]} : vector<8x128xf32> to vector<8x32xf32>
    %cst_33 = arith.constant 0.000000e+00 : f32
    %58 = vector.broadcast %cst_33 : f32 to vector<8x1xf32>
    %59 = vector.extract_strided_slice %57 {offsets = [0, 0], sizes = [8, 31], strides = [1, 1]} : vector<8x32xf32> to vector<8x31xf32>
    %60 = tpu.concatenate %58, %59 in 1 : vector<8x1xf32>, vector<8x31xf32> -> vector<8x32xf32>
    %61 = vector.extract_strided_slice %57 {offsets = [0, 1], sizes = [8, 31], strides = [1, 1]} : vector<8x32xf32> to vector<8x31xf32>
    %cst_34 = arith.constant 0.000000e+00 : f32
    %62 = vector.broadcast %cst_34 : f32 to vector<8x1xf32>
    %63 = tpu.concatenate %61, %62 in 1 : vector<8x31xf32>, vector<8x1xf32> -> vector<8x32xf32>
    %64 = tpu.concatenate %60, %57, %63 in 0 : vector<8x32xf32>, vector<8x32xf32>, vector<8x32xf32> -> vector<24x32xf32>
    %65 = vector.extract_strided_slice %56 {offsets = [0, 32], sizes = [8, 32], strides = [1, 1]} : vector<8x128xf32> to vector<8x32xf32>
    %cst_35 = arith.constant 0.000000e+00 : f32
    %66 = vector.broadcast %cst_35 : f32 to vector<8x1xf32>
    %67 = vector.extract_strided_slice %65 {offsets = [0, 0], sizes = [8, 31], strides = [1, 1]} : vector<8x32xf32> to vector<8x31xf32>
    %68 = tpu.concatenate %66, %67 in 1 : vector<8x1xf32>, vector<8x31xf32> -> vector<8x32xf32>
    %69 = vector.extract_strided_slice %65 {offsets = [0, 1], sizes = [8, 31], strides = [1, 1]} : vector<8x32xf32> to vector<8x31xf32>
    %cst_36 = arith.constant 0.000000e+00 : f32
    %70 = vector.broadcast %cst_36 : f32 to vector<8x1xf32>
    %71 = tpu.concatenate %69, %70 in 1 : vector<8x31xf32>, vector<8x1xf32> -> vector<8x32xf32>
    %72 = tpu.concatenate %68, %65, %71 in 0 : vector<8x32xf32>, vector<8x32xf32>, vector<8x32xf32> -> vector<24x32xf32>
    %73 = vector.extract_strided_slice %56 {offsets = [0, 64], sizes = [8, 32], strides = [1, 1]} : vector<8x128xf32> to vector<8x32xf32>
    %cst_37 = arith.constant 0.000000e+00 : f32
    %74 = vector.broadcast %cst_37 : f32 to vector<8x1xf32>
    %75 = vector.extract_strided_slice %73 {offsets = [0, 0], sizes = [8, 31], strides = [1, 1]} : vector<8x32xf32> to vector<8x31xf32>
    %76 = tpu.concatenate %74, %75 in 1 : vector<8x1xf32>, vector<8x31xf32> -> vector<8x32xf32>
    %77 = vector.extract_strided_slice %73 {offsets = [0, 1], sizes = [8, 31], strides = [1, 1]} : vector<8x32xf32> to vector<8x31xf32>
    %cst_38 = arith.constant 0.000000e+00 : f32
    %78 = vector.broadcast %cst_38 : f32 to vector<8x1xf32>
    %79 = tpu.concatenate %77, %78 in 1 : vector<8x31xf32>, vector<8x1xf32> -> vector<8x32xf32>
    %80 = tpu.concatenate %76, %73, %79 in 0 : vector<8x32xf32>, vector<8x32xf32>, vector<8x32xf32> -> vector<24x32xf32>
    %81 = vector.extract_strided_slice %56 {offsets = [0, 96], sizes = [8, 32], strides = [1, 1]} : vector<8x128xf32> to vector<8x32xf32>
    %cst_39 = arith.constant 0.000000e+00 : f32
    %82 = vector.broadcast %cst_39 : f32 to vector<8x1xf32>
    %83 = vector.extract_strided_slice %81 {offsets = [0, 0], sizes = [8, 31], strides = [1, 1]} : vector<8x32xf32> to vector<8x31xf32>
    %84 = tpu.concatenate %82, %83 in 1 : vector<8x1xf32>, vector<8x31xf32> -> vector<8x32xf32>
    %85 = vector.extract_strided_slice %81 {offsets = [0, 1], sizes = [8, 31], strides = [1, 1]} : vector<8x32xf32> to vector<8x31xf32>
    %cst_40 = arith.constant 0.000000e+00 : f32
    %86 = vector.broadcast %cst_40 : f32 to vector<8x1xf32>
    %87 = tpu.concatenate %85, %86 in 1 : vector<8x31xf32>, vector<8x1xf32> -> vector<8x32xf32>
    %88 = tpu.concatenate %84, %81, %87 in 0 : vector<8x32xf32>, vector<8x32xf32>, vector<8x32xf32> -> vector<24x32xf32>
    %89 = tpu.concatenate %64, %72, %80, %88 in 1 : vector<24x32xf32>, vector<24x32xf32>, vector<24x32xf32>, vector<24x32xf32> -> vector<24x128xf32>
    %cst_41 = arith.constant dense<0.000000e+00> : vector<8x128xf32>
    %90 = tpu.matmul %16, %89, %cst_41 {dimension_numbers = #tpu.dot_dimension_numbers<[1], [0], [0], [1], [0, 0, 1, 1], [], []>} : vector<8x24xf32>, vector<24x128xf32>, vector<8x128xf32> -> vector<8x128xf32>
    %91 = vector.broadcast %18 : vector<8x1xf32> to vector<8x128xf32>
    %92 = arith.addf %90, %91 : vector<8x128xf32>
    %cst_42 = arith.constant 0.000000e+00 : f32
    %93 = vector.broadcast %cst_42 : f32 to vector<8x128xf32>
    %94 = arith.maximumf %92, %93 : vector<8x128xf32>
    %95 = arith.addf %94, %8 : vector<8x128xf32>
    %cst_43 = arith.constant 0.000000e+00 : f32
    %96 = vector.broadcast %cst_43 : f32 to vector<8x128xf32>
    %97 = arith.maximumf %95, %96 : vector<8x128xf32>
    %c1_44 = arith.constant 1 : index
    %c0_45 = arith.constant 0 : index
    %c0_46 = arith.constant 0 : index
    %98 = vector.load %arg2[%c1_44, %c0_45, %c0_46] : memref<3x8x24xf32, #tpu.memory_space<vmem>>, vector<1x8x24xf32>
    %99 = vector.shape_cast %98 : vector<1x8x24xf32> to vector<8x24xf32>
    %c1_47 = arith.constant 1 : index
    %c0_48 = arith.constant 0 : index
    %c0_49 = arith.constant 0 : index
    %100 = vector.load %arg3[%c1_47, %c0_48, %c0_49] : memref<3x8x1xf32, #tpu.memory_space<vmem>>, vector<1x8x1xf32>
    %101 = vector.shape_cast %100 : vector<1x8x1xf32> to vector<8x1xf32>
    %c1_50 = arith.constant 1 : index
    %c0_51 = arith.constant 0 : index
    %c0_52 = arith.constant 0 : index
    %102 = vector.load %arg4[%c1_50, %c0_51, %c0_52] : memref<3x8x24xf32, #tpu.memory_space<vmem>>, vector<1x8x24xf32>
    %103 = vector.shape_cast %102 : vector<1x8x24xf32> to vector<8x24xf32>
    %c1_53 = arith.constant 1 : index
    %c0_54 = arith.constant 0 : index
    %c0_55 = arith.constant 0 : index
    %104 = vector.load %arg5[%c1_53, %c0_54, %c0_55] : memref<3x8x1xf32, #tpu.memory_space<vmem>>, vector<1x8x1xf32>
    %105 = vector.shape_cast %104 : vector<1x8x1xf32> to vector<8x1xf32>
    %106 = vector.extract_strided_slice %97 {offsets = [0, 0], sizes = [8, 32], strides = [1, 1]} : vector<8x128xf32> to vector<8x32xf32>
    %cst_56 = arith.constant 0.000000e+00 : f32
    %107 = vector.broadcast %cst_56 : f32 to vector<8x2xf32>
    %108 = vector.extract_strided_slice %106 {offsets = [0, 0], sizes = [8, 30], strides = [1, 1]} : vector<8x32xf32> to vector<8x30xf32>
    %109 = tpu.concatenate %107, %108 in 1 : vector<8x2xf32>, vector<8x30xf32> -> vector<8x32xf32>
    %110 = vector.extract_strided_slice %106 {offsets = [0, 2], sizes = [8, 30], strides = [1, 1]} : vector<8x32xf32> to vector<8x30xf32>
    %cst_57 = arith.constant 0.000000e+00 : f32
    %111 = vector.broadcast %cst_57 : f32 to vector<8x2xf32>
    %112 = tpu.concatenate %110, %111 in 1 : vector<8x30xf32>, vector<8x2xf32> -> vector<8x32xf32>
    %113 = tpu.concatenate %109, %106, %112 in 0 : vector<8x32xf32>, vector<8x32xf32>, vector<8x32xf32> -> vector<24x32xf32>
    %114 = vector.extract_strided_slice %97 {offsets = [0, 32], sizes = [8, 32], strides = [1, 1]} : vector<8x128xf32> to vector<8x32xf32>
    %cst_58 = arith.constant 0.000000e+00 : f32
    %115 = vector.broadcast %cst_58 : f32 to vector<8x2xf32>
    %116 = vector.extract_strided_slice %114 {offsets = [0, 0], sizes = [8, 30], strides = [1, 1]} : vector<8x32xf32> to vector<8x30xf32>
    %117 = tpu.concatenate %115, %116 in 1 : vector<8x2xf32>, vector<8x30xf32> -> vector<8x32xf32>
    %118 = vector.extract_strided_slice %114 {offsets = [0, 2], sizes = [8, 30], strides = [1, 1]} : vector<8x32xf32> to vector<8x30xf32>
    %cst_59 = arith.constant 0.000000e+00 : f32
    %119 = vector.broadcast %cst_59 : f32 to vector<8x2xf32>
    %120 = tpu.concatenate %118, %119 in 1 : vector<8x30xf32>, vector<8x2xf32> -> vector<8x32xf32>
    %121 = tpu.concatenate %117, %114, %120 in 0 : vector<8x32xf32>, vector<8x32xf32>, vector<8x32xf32> -> vector<24x32xf32>
    %122 = vector.extract_strided_slice %97 {offsets = [0, 64], sizes = [8, 32], strides = [1, 1]} : vector<8x128xf32> to vector<8x32xf32>
    %cst_60 = arith.constant 0.000000e+00 : f32
    %123 = vector.broadcast %cst_60 : f32 to vector<8x2xf32>
    %124 = vector.extract_strided_slice %122 {offsets = [0, 0], sizes = [8, 30], strides = [1, 1]} : vector<8x32xf32> to vector<8x30xf32>
    %125 = tpu.concatenate %123, %124 in 1 : vector<8x2xf32>, vector<8x30xf32> -> vector<8x32xf32>
    %126 = vector.extract_strided_slice %122 {offsets = [0, 2], sizes = [8, 30], strides = [1, 1]} : vector<8x32xf32> to vector<8x30xf32>
    %cst_61 = arith.constant 0.000000e+00 : f32
    %127 = vector.broadcast %cst_61 : f32 to vector<8x2xf32>
    %128 = tpu.concatenate %126, %127 in 1 : vector<8x30xf32>, vector<8x2xf32> -> vector<8x32xf32>
    %129 = tpu.concatenate %125, %122, %128 in 0 : vector<8x32xf32>, vector<8x32xf32>, vector<8x32xf32> -> vector<24x32xf32>
    %130 = vector.extract_strided_slice %97 {offsets = [0, 96], sizes = [8, 32], strides = [1, 1]} : vector<8x128xf32> to vector<8x32xf32>
    %cst_62 = arith.constant 0.000000e+00 : f32
    %131 = vector.broadcast %cst_62 : f32 to vector<8x2xf32>
    %132 = vector.extract_strided_slice %130 {offsets = [0, 0], sizes = [8, 30], strides = [1, 1]} : vector<8x32xf32> to vector<8x30xf32>
    %133 = tpu.concatenate %131, %132 in 1 : vector<8x2xf32>, vector<8x30xf32> -> vector<8x32xf32>
    %134 = vector.extract_strided_slice %130 {offsets = [0, 2], sizes = [8, 30], strides = [1, 1]} : vector<8x32xf32> to vector<8x30xf32>
    %cst_63 = arith.constant 0.000000e+00 : f32
    %135 = vector.broadcast %cst_63 : f32 to vector<8x2xf32>
    %136 = tpu.concatenate %134, %135 in 1 : vector<8x30xf32>, vector<8x2xf32> -> vector<8x32xf32>
    %137 = tpu.concatenate %133, %130, %136 in 0 : vector<8x32xf32>, vector<8x32xf32>, vector<8x32xf32> -> vector<24x32xf32>
    %138 = tpu.concatenate %113, %121, %129, %137 in 1 : vector<24x32xf32>, vector<24x32xf32>, vector<24x32xf32>, vector<24x32xf32> -> vector<24x128xf32>
    %cst_64 = arith.constant dense<0.000000e+00> : vector<8x128xf32>
    %139 = tpu.matmul %99, %138, %cst_64 {dimension_numbers = #tpu.dot_dimension_numbers<[1], [0], [0], [1], [0, 0, 1, 1], [], []>} : vector<8x24xf32>, vector<24x128xf32>, vector<8x128xf32> -> vector<8x128xf32>
    %140 = vector.broadcast %101 : vector<8x1xf32> to vector<8x128xf32>
    %141 = arith.addf %139, %140 : vector<8x128xf32>
    %cst_65 = arith.constant 0.000000e+00 : f32
    %142 = vector.broadcast %cst_65 : f32 to vector<8x128xf32>
    %143 = arith.maximumf %141, %142 : vector<8x128xf32>
    %144 = vector.extract_strided_slice %143 {offsets = [0, 0], sizes = [8, 32], strides = [1, 1]} : vector<8x128xf32> to vector<8x32xf32>
    %cst_66 = arith.constant 0.000000e+00 : f32
    %145 = vector.broadcast %cst_66 : f32 to vector<8x2xf32>
    %146 = vector.extract_strided_slice %144 {offsets = [0, 0], sizes = [8, 30], strides = [1, 1]} : vector<8x32xf32> to vector<8x30xf32>
    %147 = tpu.concatenate %145, %146 in 1 : vector<8x2xf32>, vector<8x30xf32> -> vector<8x32xf32>
    %148 = vector.extract_strided_slice %144 {offsets = [0, 2], sizes = [8, 30], strides = [1, 1]} : vector<8x32xf32> to vector<8x30xf32>
    %cst_67 = arith.constant 0.000000e+00 : f32
    %149 = vector.broadcast %cst_67 : f32 to vector<8x2xf32>
    %150 = tpu.concatenate %148, %149 in 1 : vector<8x30xf32>, vector<8x2xf32> -> vector<8x32xf32>
    %151 = tpu.concatenate %147, %144, %150 in 0 : vector<8x32xf32>, vector<8x32xf32>, vector<8x32xf32> -> vector<24x32xf32>
    %152 = vector.extract_strided_slice %143 {offsets = [0, 32], sizes = [8, 32], strides = [1, 1]} : vector<8x128xf32> to vector<8x32xf32>
    %cst_68 = arith.constant 0.000000e+00 : f32
    %153 = vector.broadcast %cst_68 : f32 to vector<8x2xf32>
    %154 = vector.extract_strided_slice %152 {offsets = [0, 0], sizes = [8, 30], strides = [1, 1]} : vector<8x32xf32> to vector<8x30xf32>
    %155 = tpu.concatenate %153, %154 in 1 : vector<8x2xf32>, vector<8x30xf32> -> vector<8x32xf32>
    %156 = vector.extract_strided_slice %152 {offsets = [0, 2], sizes = [8, 30], strides = [1, 1]} : vector<8x32xf32> to vector<8x30xf32>
    %cst_69 = arith.constant 0.000000e+00 : f32
    %157 = vector.broadcast %cst_69 : f32 to vector<8x2xf32>
    %158 = tpu.concatenate %156, %157 in 1 : vector<8x30xf32>, vector<8x2xf32> -> vector<8x32xf32>
    %159 = tpu.concatenate %155, %152, %158 in 0 : vector<8x32xf32>, vector<8x32xf32>, vector<8x32xf32> -> vector<24x32xf32>
    %160 = vector.extract_strided_slice %143 {offsets = [0, 64], sizes = [8, 32], strides = [1, 1]} : vector<8x128xf32> to vector<8x32xf32>
    %cst_70 = arith.constant 0.000000e+00 : f32
    %161 = vector.broadcast %cst_70 : f32 to vector<8x2xf32>
    %162 = vector.extract_strided_slice %160 {offsets = [0, 0], sizes = [8, 30], strides = [1, 1]} : vector<8x32xf32> to vector<8x30xf32>
    %163 = tpu.concatenate %161, %162 in 1 : vector<8x2xf32>, vector<8x30xf32> -> vector<8x32xf32>
    %164 = vector.extract_strided_slice %160 {offsets = [0, 2], sizes = [8, 30], strides = [1, 1]} : vector<8x32xf32> to vector<8x30xf32>
    %cst_71 = arith.constant 0.000000e+00 : f32
    %165 = vector.broadcast %cst_71 : f32 to vector<8x2xf32>
    %166 = tpu.concatenate %164, %165 in 1 : vector<8x30xf32>, vector<8x2xf32> -> vector<8x32xf32>
    %167 = tpu.concatenate %163, %160, %166 in 0 : vector<8x32xf32>, vector<8x32xf32>, vector<8x32xf32> -> vector<24x32xf32>
    %168 = vector.extract_strided_slice %143 {offsets = [0, 96], sizes = [8, 32], strides = [1, 1]} : vector<8x128xf32> to vector<8x32xf32>
    %cst_72 = arith.constant 0.000000e+00 : f32
    %169 = vector.broadcast %cst_72 : f32 to vector<8x2xf32>
    %170 = vector.extract_strided_slice %168 {offsets = [0, 0], sizes = [8, 30], strides = [1, 1]} : vector<8x32xf32> to vector<8x30xf32>
    %171 = tpu.concatenate %169, %170 in 1 : vector<8x2xf32>, vector<8x30xf32> -> vector<8x32xf32>
    %172 = vector.extract_strided_slice %168 {offsets = [0, 2], sizes = [8, 30], strides = [1, 1]} : vector<8x32xf32> to vector<8x30xf32>
    %cst_73 = arith.constant 0.000000e+00 : f32
    %173 = vector.broadcast %cst_73 : f32 to vector<8x2xf32>
    %174 = tpu.concatenate %172, %173 in 1 : vector<8x30xf32>, vector<8x2xf32> -> vector<8x32xf32>
    %175 = tpu.concatenate %171, %168, %174 in 0 : vector<8x32xf32>, vector<8x32xf32>, vector<8x32xf32> -> vector<24x32xf32>
    %176 = tpu.concatenate %151, %159, %167, %175 in 1 : vector<24x32xf32>, vector<24x32xf32>, vector<24x32xf32>, vector<24x32xf32> -> vector<24x128xf32>
    %cst_74 = arith.constant dense<0.000000e+00> : vector<8x128xf32>
    %177 = tpu.matmul %103, %176, %cst_74 {dimension_numbers = #tpu.dot_dimension_numbers<[1], [0], [0], [1], [0, 0, 1, 1], [], []>} : vector<8x24xf32>, vector<24x128xf32>, vector<8x128xf32> -> vector<8x128xf32>
    %178 = vector.broadcast %105 : vector<8x1xf32> to vector<8x128xf32>
    %179 = arith.addf %177, %178 : vector<8x128xf32>
    %cst_75 = arith.constant 0.000000e+00 : f32
    %180 = vector.broadcast %cst_75 : f32 to vector<8x128xf32>
    %181 = arith.maximumf %179, %180 : vector<8x128xf32>
    %182 = arith.addf %181, %97 : vector<8x128xf32>
    %cst_76 = arith.constant 0.000000e+00 : f32
    %183 = vector.broadcast %cst_76 : f32 to vector<8x128xf32>
    %184 = arith.maximumf %182, %183 : vector<8x128xf32>
    %185 = vector.extract_strided_slice %184 {offsets = [0, 0], sizes = [8, 32], strides = [1, 1]} : vector<8x128xf32> to vector<8x32xf32>
    %186 = vector.extract_strided_slice %184 {offsets = [0, 32], sizes = [8, 32], strides = [1, 1]} : vector<8x128xf32> to vector<8x32xf32>
    %187 = vector.extract_strided_slice %184 {offsets = [0, 64], sizes = [8, 32], strides = [1, 1]} : vector<8x128xf32> to vector<8x32xf32>
    %188 = vector.extract_strided_slice %184 {offsets = [0, 96], sizes = [8, 32], strides = [1, 1]} : vector<8x128xf32> to vector<8x32xf32>
    %189 = tpu.concatenate %185, %186, %187, %188 in 0 : vector<8x32xf32>, vector<8x32xf32>, vector<8x32xf32>, vector<8x32xf32> -> vector<32x32xf32>
    %cst_77 = arith.constant dense<0.000000e+00> : vector<32x32xf32>
    %190 = tpu.matmul %189, %9, %cst_77 {dimension_numbers = #tpu.dot_dimension_numbers<[1], [0], [0], [1], [0, 0, 1, 1], [], []>} : vector<32x32xf32>, vector<32x32xf32>, vector<32x32xf32> -> vector<32x32xf32>
    %191 = vector.extract_strided_slice %190 {offsets = [0, 0], sizes = [8, 32], strides = [1, 1]} : vector<32x32xf32> to vector<8x32xf32>
    %192 = vector.extract_strided_slice %190 {offsets = [8, 0], sizes = [8, 32], strides = [1, 1]} : vector<32x32xf32> to vector<8x32xf32>
    %193 = vector.extract_strided_slice %190 {offsets = [16, 0], sizes = [8, 32], strides = [1, 1]} : vector<32x32xf32> to vector<8x32xf32>
    %194 = vector.extract_strided_slice %190 {offsets = [24, 0], sizes = [8, 32], strides = [1, 1]} : vector<32x32xf32> to vector<8x32xf32>
    %195 = tpu.concatenate %191, %192, %193, %194 in 1 : vector<8x32xf32>, vector<8x32xf32>, vector<8x32xf32>, vector<8x32xf32> -> vector<8x128xf32>
    %c0_78 = arith.constant 0 : index
    %c0_79 = arith.constant 0 : index
    %c0_80 = arith.constant 0 : index
    %196 = vector.load %arg8[%c0_78, %c0_79, %c0_80] : memref<2x8x8xf32, #tpu.memory_space<vmem>>, vector<1x8x8xf32>
    %197 = vector.shape_cast %196 : vector<1x8x8xf32> to vector<8x8xf32>
    %cst_81 = arith.constant dense<0.000000e+00> : vector<8x128xf32>
    %198 = tpu.matmul %197, %195, %cst_81 {dimension_numbers = #tpu.dot_dimension_numbers<[1], [0], [0], [1], [0, 0, 1, 1], [], []>} : vector<8x8xf32>, vector<8x128xf32>, vector<8x128xf32> -> vector<8x128xf32>
    %199 = vector.broadcast %10 : vector<1x128xf32> to vector<8x128xf32>
    %200 = arith.addf %198, %199 : vector<8x128xf32>
    %c2_82 = arith.constant 2 : index
    %c0_83 = arith.constant 0 : index
    %c0_84 = arith.constant 0 : index
    %201 = vector.load %arg2[%c2_82, %c0_83, %c0_84] : memref<3x8x24xf32, #tpu.memory_space<vmem>>, vector<1x8x24xf32>
    %202 = vector.shape_cast %201 : vector<1x8x24xf32> to vector<8x24xf32>
    %c2_85 = arith.constant 2 : index
    %c0_86 = arith.constant 0 : index
    %c0_87 = arith.constant 0 : index
    %203 = vector.load %arg3[%c2_85, %c0_86, %c0_87] : memref<3x8x1xf32, #tpu.memory_space<vmem>>, vector<1x8x1xf32>
    %204 = vector.shape_cast %203 : vector<1x8x1xf32> to vector<8x1xf32>
    %c2_88 = arith.constant 2 : index
    %c0_89 = arith.constant 0 : index
    %c0_90 = arith.constant 0 : index
    %205 = vector.load %arg4[%c2_88, %c0_89, %c0_90] : memref<3x8x24xf32, #tpu.memory_space<vmem>>, vector<1x8x24xf32>
    %206 = vector.shape_cast %205 : vector<1x8x24xf32> to vector<8x24xf32>
    %c2_91 = arith.constant 2 : index
    %c0_92 = arith.constant 0 : index
    %c0_93 = arith.constant 0 : index
    %207 = vector.load %arg5[%c2_91, %c0_92, %c0_93] : memref<3x8x1xf32, #tpu.memory_space<vmem>>, vector<1x8x1xf32>
    %208 = vector.shape_cast %207 : vector<1x8x1xf32> to vector<8x1xf32>
    %209 = vector.extract_strided_slice %200 {offsets = [0, 0], sizes = [8, 32], strides = [1, 1]} : vector<8x128xf32> to vector<8x32xf32>
    %cst_94 = arith.constant 0.000000e+00 : f32
    %210 = vector.broadcast %cst_94 : f32 to vector<8x4xf32>
    %211 = vector.extract_strided_slice %209 {offsets = [0, 0], sizes = [8, 28], strides = [1, 1]} : vector<8x32xf32> to vector<8x28xf32>
    %212 = tpu.concatenate %210, %211 in 1 : vector<8x4xf32>, vector<8x28xf32> -> vector<8x32xf32>
    %213 = vector.extract_strided_slice %209 {offsets = [0, 4], sizes = [8, 28], strides = [1, 1]} : vector<8x32xf32> to vector<8x28xf32>
    %cst_95 = arith.constant 0.000000e+00 : f32
    %214 = vector.broadcast %cst_95 : f32 to vector<8x4xf32>
    %215 = tpu.concatenate %213, %214 in 1 : vector<8x28xf32>, vector<8x4xf32> -> vector<8x32xf32>
    %216 = tpu.concatenate %212, %209, %215 in 0 : vector<8x32xf32>, vector<8x32xf32>, vector<8x32xf32> -> vector<24x32xf32>
    %217 = vector.extract_strided_slice %200 {offsets = [0, 32], sizes = [8, 32], strides = [1, 1]} : vector<8x128xf32> to vector<8x32xf32>
    %cst_96 = arith.constant 0.000000e+00 : f32
    %218 = vector.broadcast %cst_96 : f32 to vector<8x4xf32>
    %219 = vector.extract_strided_slice %217 {offsets = [0, 0], sizes = [8, 28], strides = [1, 1]} : vector<8x32xf32> to vector<8x28xf32>
    %220 = tpu.concatenate %218, %219 in 1 : vector<8x4xf32>, vector<8x28xf32> -> vector<8x32xf32>
    %221 = vector.extract_strided_slice %217 {offsets = [0, 4], sizes = [8, 28], strides = [1, 1]} : vector<8x32xf32> to vector<8x28xf32>
    %cst_97 = arith.constant 0.000000e+00 : f32
    %222 = vector.broadcast %cst_97 : f32 to vector<8x4xf32>
    %223 = tpu.concatenate %221, %222 in 1 : vector<8x28xf32>, vector<8x4xf32> -> vector<8x32xf32>
    %224 = tpu.concatenate %220, %217, %223 in 0 : vector<8x32xf32>, vector<8x32xf32>, vector<8x32xf32> -> vector<24x32xf32>
    %225 = vector.extract_strided_slice %200 {offsets = [0, 64], sizes = [8, 32], strides = [1, 1]} : vector<8x128xf32> to vector<8x32xf32>
    %cst_98 = arith.constant 0.000000e+00 : f32
    %226 = vector.broadcast %cst_98 : f32 to vector<8x4xf32>
    %227 = vector.extract_strided_slice %225 {offsets = [0, 0], sizes = [8, 28], strides = [1, 1]} : vector<8x32xf32> to vector<8x28xf32>
    %228 = tpu.concatenate %226, %227 in 1 : vector<8x4xf32>, vector<8x28xf32> -> vector<8x32xf32>
    %229 = vector.extract_strided_slice %225 {offsets = [0, 4], sizes = [8, 28], strides = [1, 1]} : vector<8x32xf32> to vector<8x28xf32>
    %cst_99 = arith.constant 0.000000e+00 : f32
    %230 = vector.broadcast %cst_99 : f32 to vector<8x4xf32>
    %231 = tpu.concatenate %229, %230 in 1 : vector<8x28xf32>, vector<8x4xf32> -> vector<8x32xf32>
    %232 = tpu.concatenate %228, %225, %231 in 0 : vector<8x32xf32>, vector<8x32xf32>, vector<8x32xf32> -> vector<24x32xf32>
    %233 = vector.extract_strided_slice %200 {offsets = [0, 96], sizes = [8, 32], strides = [1, 1]} : vector<8x128xf32> to vector<8x32xf32>
    %cst_100 = arith.constant 0.000000e+00 : f32
    %234 = vector.broadcast %cst_100 : f32 to vector<8x4xf32>
    %235 = vector.extract_strided_slice %233 {offsets = [0, 0], sizes = [8, 28], strides = [1, 1]} : vector<8x32xf32> to vector<8x28xf32>
    %236 = tpu.concatenate %234, %235 in 1 : vector<8x4xf32>, vector<8x28xf32> -> vector<8x32xf32>
    %237 = vector.extract_strided_slice %233 {offsets = [0, 4], sizes = [8, 28], strides = [1, 1]} : vector<8x32xf32> to vector<8x28xf32>
    %cst_101 = arith.constant 0.000000e+00 : f32
    %238 = vector.broadcast %cst_101 : f32 to vector<8x4xf32>
    %239 = tpu.concatenate %237, %238 in 1 : vector<8x28xf32>, vector<8x4xf32> -> vector<8x32xf32>
    %240 = tpu.concatenate %236, %233, %239 in 0 : vector<8x32xf32>, vector<8x32xf32>, vector<8x32xf32> -> vector<24x32xf32>
    %241 = tpu.concatenate %216, %224, %232, %240 in 1 : vector<24x32xf32>, vector<24x32xf32>, vector<24x32xf32>, vector<24x32xf32> -> vector<24x128xf32>
    %cst_102 = arith.constant dense<0.000000e+00> : vector<8x128xf32>
    %242 = tpu.matmul %202, %241, %cst_102 {dimension_numbers = #tpu.dot_dimension_numbers<[1], [0], [0], [1], [0, 0, 1, 1], [], []>} : vector<8x24xf32>, vector<24x128xf32>, vector<8x128xf32> -> vector<8x128xf32>
    %243 = vector.broadcast %204 : vector<8x1xf32> to vector<8x128xf32>
    %244 = arith.addf %242, %243 : vector<8x128xf32>
    %cst_103 = arith.constant 0.000000e+00 : f32
    %245 = vector.broadcast %cst_103 : f32 to vector<8x128xf32>
    %246 = arith.maximumf %244, %245 : vector<8x128xf32>
    %247 = vector.extract_strided_slice %246 {offsets = [0, 0], sizes = [8, 32], strides = [1, 1]} : vector<8x128xf32> to vector<8x32xf32>
    %cst_104 = arith.constant 0.000000e+00 : f32
    %248 = vector.broadcast %cst_104 : f32 to vector<8x4xf32>
    %249 = vector.extract_strided_slice %247 {offsets = [0, 0], sizes = [8, 28], strides = [1, 1]} : vector<8x32xf32> to vector<8x28xf32>
    %250 = tpu.concatenate %248, %249 in 1 : vector<8x4xf32>, vector<8x28xf32> -> vector<8x32xf32>
    %251 = vector.extract_strided_slice %247 {offsets = [0, 4], sizes = [8, 28], strides = [1, 1]} : vector<8x32xf32> to vector<8x28xf32>
    %cst_105 = arith.constant 0.000000e+00 : f32
    %252 = vector.broadcast %cst_105 : f32 to vector<8x4xf32>
    %253 = tpu.concatenate %251, %252 in 1 : vector<8x28xf32>, vector<8x4xf32> -> vector<8x32xf32>
    %254 = tpu.concatenate %250, %247, %253 in 0 : vector<8x32xf32>, vector<8x32xf32>, vector<8x32xf32> -> vector<24x32xf32>
    %255 = vector.extract_strided_slice %246 {offsets = [0, 32], sizes = [8, 32], strides = [1, 1]} : vector<8x128xf32> to vector<8x32xf32>
    %cst_106 = arith.constant 0.000000e+00 : f32
    %256 = vector.broadcast %cst_106 : f32 to vector<8x4xf32>
    %257 = vector.extract_strided_slice %255 {offsets = [0, 0], sizes = [8, 28], strides = [1, 1]} : vector<8x32xf32> to vector<8x28xf32>
    %258 = tpu.concatenate %256, %257 in 1 : vector<8x4xf32>, vector<8x28xf32> -> vector<8x32xf32>
    %259 = vector.extract_strided_slice %255 {offsets = [0, 4], sizes = [8, 28], strides = [1, 1]} : vector<8x32xf32> to vector<8x28xf32>
    %cst_107 = arith.constant 0.000000e+00 : f32
    %260 = vector.broadcast %cst_107 : f32 to vector<8x4xf32>
    %261 = tpu.concatenate %259, %260 in 1 : vector<8x28xf32>, vector<8x4xf32> -> vector<8x32xf32>
    %262 = tpu.concatenate %258, %255, %261 in 0 : vector<8x32xf32>, vector<8x32xf32>, vector<8x32xf32> -> vector<24x32xf32>
    %263 = vector.extract_strided_slice %246 {offsets = [0, 64], sizes = [8, 32], strides = [1, 1]} : vector<8x128xf32> to vector<8x32xf32>
    %cst_108 = arith.constant 0.000000e+00 : f32
    %264 = vector.broadcast %cst_108 : f32 to vector<8x4xf32>
    %265 = vector.extract_strided_slice %263 {offsets = [0, 0], sizes = [8, 28], strides = [1, 1]} : vector<8x32xf32> to vector<8x28xf32>
    %266 = tpu.concatenate %264, %265 in 1 : vector<8x4xf32>, vector<8x28xf32> -> vector<8x32xf32>
    %267 = vector.extract_strided_slice %263 {offsets = [0, 4], sizes = [8, 28], strides = [1, 1]} : vector<8x32xf32> to vector<8x28xf32>
    %cst_109 = arith.constant 0.000000e+00 : f32
    %268 = vector.broadcast %cst_109 : f32 to vector<8x4xf32>
    %269 = tpu.concatenate %267, %268 in 1 : vector<8x28xf32>, vector<8x4xf32> -> vector<8x32xf32>
    %270 = tpu.concatenate %266, %263, %269 in 0 : vector<8x32xf32>, vector<8x32xf32>, vector<8x32xf32> -> vector<24x32xf32>
    %271 = vector.extract_strided_slice %246 {offsets = [0, 96], sizes = [8, 32], strides = [1, 1]} : vector<8x128xf32> to vector<8x32xf32>
    %cst_110 = arith.constant 0.000000e+00 : f32
    %272 = vector.broadcast %cst_110 : f32 to vector<8x4xf32>
    %273 = vector.extract_strided_slice %271 {offsets = [0, 0], sizes = [8, 28], strides = [1, 1]} : vector<8x32xf32> to vector<8x28xf32>
    %274 = tpu.concatenate %272, %273 in 1 : vector<8x4xf32>, vector<8x28xf32> -> vector<8x32xf32>
    %275 = vector.extract_strided_slice %271 {offsets = [0, 4], sizes = [8, 28], strides = [1, 1]} : vector<8x32xf32> to vector<8x28xf32>
    %cst_111 = arith.constant 0.000000e+00 : f32
    %276 = vector.broadcast %cst_111 : f32 to vector<8x4xf32>
    %277 = tpu.concatenate %275, %276 in 1 : vector<8x28xf32>, vector<8x4xf32> -> vector<8x32xf32>
    %278 = tpu.concatenate %274, %271, %277 in 0 : vector<8x32xf32>, vector<8x32xf32>, vector<8x32xf32> -> vector<24x32xf32>
    %279 = tpu.concatenate %254, %262, %270, %278 in 1 : vector<24x32xf32>, vector<24x32xf32>, vector<24x32xf32>, vector<24x32xf32> -> vector<24x128xf32>
    %cst_112 = arith.constant dense<0.000000e+00> : vector<8x128xf32>
    %280 = tpu.matmul %206, %279, %cst_112 {dimension_numbers = #tpu.dot_dimension_numbers<[1], [0], [0], [1], [0, 0, 1, 1], [], []>} : vector<8x24xf32>, vector<24x128xf32>, vector<8x128xf32> -> vector<8x128xf32>
    %281 = vector.broadcast %208 : vector<8x1xf32> to vector<8x128xf32>
    %282 = arith.addf %280, %281 : vector<8x128xf32>
    %cst_113 = arith.constant 0.000000e+00 : f32
    %283 = vector.broadcast %cst_113 : f32 to vector<8x128xf32>
    %284 = arith.maximumf %282, %283 : vector<8x128xf32>
    %285 = arith.addf %284, %200 : vector<8x128xf32>
    %cst_114 = arith.constant 0.000000e+00 : f32
    %286 = vector.broadcast %cst_114 : f32 to vector<8x128xf32>
    %287 = arith.maximumf %285, %286 : vector<8x128xf32>
    %288 = vector.extract_strided_slice %287 {offsets = [0, 0], sizes = [8, 32], strides = [1, 1]} : vector<8x128xf32> to vector<8x32xf32>
    %289 = vector.extract_strided_slice %287 {offsets = [0, 32], sizes = [8, 32], strides = [1, 1]} : vector<8x128xf32> to vector<8x32xf32>
    %290 = vector.extract_strided_slice %287 {offsets = [0, 64], sizes = [8, 32], strides = [1, 1]} : vector<8x128xf32> to vector<8x32xf32>
    %291 = vector.extract_strided_slice %287 {offsets = [0, 96], sizes = [8, 32], strides = [1, 1]} : vector<8x128xf32> to vector<8x32xf32>
    %292 = tpu.concatenate %288, %289, %290, %291 in 0 : vector<8x32xf32>, vector<8x32xf32>, vector<8x32xf32>, vector<8x32xf32> -> vector<32x32xf32>
    %cst_115 = arith.constant dense<0.000000e+00> : vector<32x32xf32>
    %293 = tpu.matmul %292, %9, %cst_115 {dimension_numbers = #tpu.dot_dimension_numbers<[1], [0], [0], [1], [0, 0, 1, 1], [], []>} : vector<32x32xf32>, vector<32x32xf32>, vector<32x32xf32> -> vector<32x32xf32>
    %294 = vector.extract_strided_slice %293 {offsets = [0, 0], sizes = [8, 32], strides = [1, 1]} : vector<32x32xf32> to vector<8x32xf32>
    %295 = vector.extract_strided_slice %293 {offsets = [8, 0], sizes = [8, 32], strides = [1, 1]} : vector<32x32xf32> to vector<8x32xf32>
    %296 = vector.extract_strided_slice %293 {offsets = [16, 0], sizes = [8, 32], strides = [1, 1]} : vector<32x32xf32> to vector<8x32xf32>
    %297 = vector.extract_strided_slice %293 {offsets = [24, 0], sizes = [8, 32], strides = [1, 1]} : vector<32x32xf32> to vector<8x32xf32>
    %298 = tpu.concatenate %294, %295, %296, %297 in 1 : vector<8x32xf32>, vector<8x32xf32>, vector<8x32xf32>, vector<8x32xf32> -> vector<8x128xf32>
    %c1_116 = arith.constant 1 : index
    %c0_117 = arith.constant 0 : index
    %c0_118 = arith.constant 0 : index
    %299 = vector.load %arg8[%c1_116, %c0_117, %c0_118] : memref<2x8x8xf32, #tpu.memory_space<vmem>>, vector<1x8x8xf32>
    %300 = vector.shape_cast %299 : vector<1x8x8xf32> to vector<8x8xf32>
    %cst_119 = arith.constant dense<0.000000e+00> : vector<8x128xf32>
    %301 = tpu.matmul %300, %298, %cst_119 {dimension_numbers = #tpu.dot_dimension_numbers<[1], [0], [0], [1], [0, 0, 1, 1], [], []>} : vector<8x8xf32>, vector<8x128xf32>, vector<8x128xf32> -> vector<8x128xf32>
    %302 = vector.broadcast %10 : vector<1x128xf32> to vector<8x128xf32>
    %303 = arith.addf %301, %302 : vector<8x128xf32>
    %c0_120 = arith.constant 0 : index
    %c0_121 = arith.constant 0 : index
    %c0_122 = arith.constant 0 : index
    %304 = vector.load %arg9[%c0_120, %c0_121, %c0_122] : memref<1x8x128xf32, #tpu.memory_space<vmem>>, vector<1x8x128xf32>
    %305 = vector.shape_cast %304 : vector<1x8x128xf32> to vector<8x128xf32>
    %306 = vector.shape_cast %303 : vector<8x128xf32> to vector<1x8x128xf32>
    tpu.vector_store %arg9[%c0_120, %c0_121, %c0_122], %306 {strides = array<i32>} : memref<1x8x128xf32, #tpu.memory_space<vmem>>, vector<1x8x128xf32>,
    return
  }
  func.func @transform_0(%arg0: i32) -> (i32, i32, i32) {
    %c0_i32 = arith.constant 0 : i32
    %c0_i32_0 = arith.constant 0 : i32
    %c0_i32_1 = arith.constant 0 : i32
    return %arg0, %c0_i32, %c0_i32_0 : i32, i32, i32
  }
  func.func @transform_1(%arg0: i32) -> (i32, i32, i32) {
    %c0_i32 = arith.constant 0 : i32
    %c0_i32_0 = arith.constant 0 : i32
    %c0_i32_1 = arith.constant 0 : i32
    %c0_i32_2 = arith.constant 0 : i32
    return %c0_i32, %c0_i32_0, %c0_i32_1 : i32, i32, i32
  }
  func.func @transform_2(%arg0: i32) -> (i32, i32, i32) {
    %c0_i32 = arith.constant 0 : i32
    %c0_i32_0 = arith.constant 0 : i32
    %c0_i32_1 = arith.constant 0 : i32
    %c0_i32_2 = arith.constant 0 : i32
    return %c0_i32, %c0_i32_0, %c0_i32_1 : i32, i32, i32
  }
  func.func @transform_3(%arg0: i32) -> (i32, i32, i32) {
    %c0_i32 = arith.constant 0 : i32
    %c0_i32_0 = arith.constant 0 : i32
    %c0_i32_1 = arith.constant 0 : i32
    %c0_i32_2 = arith.constant 0 : i32
    return %c0_i32, %c0_i32_0, %c0_i32_1 : i32, i32, i32
  }
  func.func @transform_4(%arg0: i32) -> (i32, i32, i32) {
    %c0_i32 = arith.constant 0 : i32
    %c0_i32_0 = arith.constant 0 : i32
    %c0_i32_1 = arith.constant 0 : i32
    %c0_i32_2 = arith.constant 0 : i32
    return %c0_i32, %c0_i32_0, %c0_i32_1 : i32, i32, i32
  }
  func.func @transform_5(%arg0: i32) -> (i32, i32) {
    %c0_i32 = arith.constant 0 : i32
    %c0_i32_0 = arith.constant 0 : i32
    %c0_i32_1 = arith.constant 0 : i32
    return %c0_i32, %c0_i32_0 : i32, i32
  }
  func.func @transform_6(%arg0: i32) -> (i32, i32) {
    %c0_i32 = arith.constant 0 : i32
    %c0_i32_0 = arith.constant 0 : i32
    %c0_i32_1 = arith.constant 0 : i32
    return %c0_i32, %c0_i32_0 : i32, i32
  }
  func.func @transform_7(%arg0: i32) -> (i32, i32, i32) {
    %c0_i32 = arith.constant 0 : i32
    %c0_i32_0 = arith.constant 0 : i32
    %c0_i32_1 = arith.constant 0 : i32
    %c0_i32_2 = arith.constant 0 : i32
    return %c0_i32, %c0_i32_0, %c0_i32_1 : i32, i32, i32
  }
  func.func @transform_8(%arg0: i32) -> (i32, i32, i32) {
    %c0_i32 = arith.constant 0 : i32
    %c0_i32_0 = arith.constant 0 : i32
    %c0_i32_1 = arith.constant 0 : i32
    return %arg0, %c0_i32, %c0_i32_0 : i32, i32, i32
  }
}

</mosaic_0001>

<bundles_post_ra>
// kernel: graph_temporal_embedding_forward.1
= control target key start
LH: loop header
LB: loop body
LE: loop exit
PB: predicated region body
PF: predicated region fallthrough
CT: control target
= control target key end

     0   :  { %13 = vsyncpa [#allocation3], 0  ;;  %s2268_s27 = smov 0   ;;  %s2708_s0 = inlined_call_operand.vmem [shape: f32[16,8,32], index: 0, kind: input, shape index: {}]   ;;  %s2709_s1 = inlined_call_operand.vmem [shape: f32[3,8,24], index: 1, kind: input, shape index: {}]   ;;  %s2710_s2 = inlined_call_operand.vmem [shape: f32[3,8,1], index: 2, kind: input, shape index: {}]   ;;  %s2711_s3 = inlined_call_operand.hbm [shape: f32[3,8,24], index: 3, kind: input, shape index: {}]   ;;  %s2712_s4 = inlined_call_operand.vmem [shape: f32[3,8,1], index: 4, kind: input, shape index: {}]   ;;  %s2713_s5 = inlined_call_operand.vmem [shape: f32[32,32], index: 5, kind: input, shape index: {}]   ;;  %s2714_s6 = inlined_call_operand.vmem [shape: f32[1,128], index: 6, kind: input, shape index: {}]   ;;  %s2715_s7 = inlined_call_operand.vmem [shape: f32[2,8,8], index: 7, kind: input, shape index: {}]   ;;  %s2716_s8 = inlined_call_operand.vmem [shape: f32[4,8,128], index: 8, kind: output, shape index: {}]  }
   0x1 LB: > { %s2274_s28 = sadd.s32 4294967295, %s2187_s27   ;;  %p1798_p0 = scmp.ge.s32.totalorder %s2187_s27, 1  ;;  %s2187_s27 = sphi %s2268_s27, %s19_s27  }
   0x2   : > { %p223_p1 = scmp.lt.s32.totalorder %s2187_s27, 5  ;;  %s2189_s29 = smov [#allocation2]  }
   0x3   : > { %s241_s30 = sshll.u32 %s2189_s29, 4  ;;  %p2717_p3 = scmp.eq.s32.totalorder %s2274_s28, 0  ;;  %s242_s30 = int_to_ptr.vmem [resolvable:$true] %s241_s30 }
   0x4   : > { %p2278_p2 = pnand %p1798_p0, %p223_p1  ;;  %s2149_s13 = scalar_lea.hbm %s2711_s3, 384 }
   0x5   : > { %p2150_p6 = scmp.ne.s32.totalorder %s2711_s3, %s2149_s13  ;;  %p2156_p10 = scmp.lt.u32.totalorder %s2149_s13, %s2711_s3 }
   0x6   : > { %s2719_s9 = scalar_select %p2278_p2, 1, 0 }
   0x7   : > { %p2009_p4 = pneg %p2278_p2 }
   0x9   : > { %p2287_p5 = pnand %p2717_p3, %p2009_p4 }
   0xb   : > { %p2151_p7 = pneg %p2287_p5 }
   0xd   : > { %p2152_p8 = pnand %p2151_p7, %p2150_p6 }
   0xf   : > { %p2153_p9 = pneg %p2152_p8 }
  0x11   : > { %p2158_p11 = pnand %p2156_p10, %p2153_p9 }
  0x13   : > { %2161 = shalt.err (!%p2158_p11)
}
  0x14   : > { %s2162_s18 = scalar_lea.vmem %s242_s30, 384  ;;  %p2170_p1 = scmp.lt.s32.totalorder %s242_s30, %s242_s30 }
  0x15   : > { %p2163_p12 = scmp.ne.s32.totalorder %s242_s30, %s2162_s18  ;;  %p2171_p4 = scmp.lt.s32.totalorder %s2162_s18, %s2162_s18 }
  0x17   : > { %p2165_p13 = pnand %p2163_p12, %p2151_p7  ;;  %p2172_p3 = por %p2171_p4, %p2170_p1 }
  0x19   : > { %p2166_p0 = pneg %p2165_p13 }
  0x1b   : > { %p2173_p2 = pnand %p2172_p3, %p2166_p0 }
  0x1d   : > { %2176 = shalt.err (!%p2173_p2)
}
  0x1e   : > { %s2190_s19 = smov 128   ;;  %s2191_s20 = smov 8  }
  0x1f   : > { %2012 = dma.hbm_to_vmem [thread:$0]  (!%p2287_p5), %s2711_s3, 384, %s242_s30, [#allocation3], %s2190_s19, %s2190_s19, %s2191_s20  }
  0x20   : > { %p2721_p6 = scmp.ne.s32.totalorder %s2719_s9, 0 }
  0x21   : > { %p2722_p8 = scmp.eq.s32.totalorder (!%p2721_p6), %s2274_s28, 0 }
  0x22   : > { %278 = sbr.rel (%p2721_p6) target bundleno = 4316 (0x10dc), region = 52 }
  0x29   : > { %2182 = dma.done.wait (%p2722_p8), [#allocation3], 384   ;;  %p2723_p7 = pmov %p2722_p8 }
  0x2a   : > { %s1803_s23 = sshll.u32 %s2274_s28, 2  ;;  %s2192_s30 = smov 32   ;;  %vm340_vm0 = vcmask 261120   ;;  %vm342_vm1 = vcmask 523264   ;;  %vm344_vm2 = vcmask 785408   ;;  %vm359_vm3 = vcmask 7168  }
  0x2b   : > { %2184 = vsyncadd (%p2723_p7), [#allocation3], 4294966912  ;;  %p312_p2 = scmp.lt.s32.totalorder %s1803_s23, 15  ;;  %s2193_s9 = smov 96   ;;  %v2202_v14 = vmov 0.0|0.0   ;;  %vm2203_vm4 = vmmov 0  }
  0x2c   : > { %s2194_s10 = smov 64   ;;  %s2195_s11 = smov 97   ;;  %1971 = vmatprep.subr.bf16.mxu0 %v2202_v14  ;;  %1974 = vmatprep.subr.bf16.mxu1 %v2202_v14  ;;  %v2204_v21 = vmov 0.0   ;;  %v2205_v24 = vmov 0   ;;  %vm364_vm5 = vcmask 252928   ;;  %v352_v30 = vld [vmem:[%s2710_s2] sm:$0xff] }
  0x2d   : > { %s2725_s23 = smov (!%p312_p2, %s1803_s23), 15  ;;  %s2196_s12 = smov 65   ;;  %1885 = vmatprep.mubr.msk.f32.mxu0 %vm2203_vm4, %v2204_v21  ;;  %1894 = vmatprep.mubr.msk.f32.mxu1 %vm2203_vm4, %v2204_v21  ;;  %v351_v57 = vld [vmem:[%s2709_s1] sm:$0xff]  ;;  %vm443_vm6 = vcmask 195584   ;;  %vm692_vm7 = vcmask 15360   ;;  %vm697_vm8 = vcmask 244736  }
  0x2e   : > { %s1804_s24 = sshll.u32 %s2725_s23, 3  ;;  %s2197_s13 = smov 33   ;;  %2072 = vset.pattern.permute.xlu0 %v2205_v24  ;;  %2088 = vset.pattern.permute.xlu1 %v2205_v24  ;;  %vm1134_vm9 = vcmask 64512   ;;  %vm1220_vm10 = vcmask 31744   ;;  %vm1225_vm11 = vcmask 228352  }
  0x2f   : > { %s315_s29 = scalar_lea.vmem %s2708_s0, %s1804_s24  ;;  %s2198_s14 = smov 63  }
  0x30   : > { %v1806_v0 = vld [vmem:[%s315_s29 + $0x8] sm:$0xff]  ;;  %v1808_v1 = vld [vmem:[%s315_s29 + $0x18] sm:$0xff]  ;;  %v1807_v2 = vld [vmem:[%s315_s29 + $0x10] sm:$0xff]  ;;  %s2199_s15 = smov 95   ;;  %s2200_s16 = smov 1  }
  0x31   : > { %329 = vrot.lane.b32.xlu0 %v1806_v0, %s2192_s30  ;;  %337 = vrot.lane.b32.xlu1 %v1808_v1, %s2193_s9  ;;  %v321_v4 = vld [vmem:[%s315_s29] sm:$0xff]  ;;  %s2201_s17 = smov 31   ;;  %s2206_s18 = smov 127  }
  0x32   : > { %s2207_s25 = smov 98   ;;  %s2208_s26 = smov 66  }
  0x33   : > { %s2209_s29 = smov 34   ;;  %s2217_s19 = smov 36  }
  0x34   : > { %s2218_s20 = smov 60   ;;  %s2219_s21 = smov 92  }
  0x35   : > { %333 = vrot.lane.b32.xlu0 %v1807_v2, %s2194_s10  ;;  %s2220_s22 = smov 4   ;;  %s2221_s23 = smov 28  }
  0x36   : > { %s2222_s24 = smov 124   ;;  %p317_p3 = scmp.lt.s32.totalorder %s2274_s28, 3 }
  0x38   : > { %s2727_s28 = smov (!%p317_p3, %s2274_s28), 3 }
  0xa3   : > { %v330_v3 = vpop.permute.xlu0 %329  ;;  %v338_v5 = vpop.permute.xlu1 %337 }
  0xa4   : > { %v341_v6 = vsel %vm340_vm0, %v321_v4, %v330_v3 }
  0xa7   : > { %v334_v7 = vpop.permute.xlu0 %333 }
  0xa8   : > { %v343_v8 = vsel %vm342_vm1, %v341_v6, %v334_v7 }
  0xa9   : > { %v2323_v9 = vsel %vm344_vm2, %v343_v8, %v338_v5 }
  0xaa   : > { %374 = vrot.lane.b32.xlu0 %v2323_v9, %s2193_s9  ;;  %366 = vrot.lane.b32.xlu1 %v2323_v9, %s2195_s11 }
  0xae   : > { %384 = vrot.lane.b32.xlu0 %v2323_v9, %s2194_s10  ;;  %376 = vrot.lane.b32.xlu1 %v2323_v9, %s2196_s12 }
  0xb2   : > { %394 = vrot.lane.b32.xlu0 %v2323_v9, %s2192_s30  ;;  %386 = vrot.lane.b32.xlu1 %v2323_v9, %s2197_s13 }
  0xb6   : > { %380 = vrot.lane.b32.xlu0 %v2323_v9, %s2198_s14  ;;  %370 = vrot.lane.b32.xlu1 %v2323_v9, %s2199_s15 }
  0xba   : > { %356 = vrot.lane.b32.xlu0 %v2323_v9, %s2200_s16  ;;  %390 = vrot.lane.b32.xlu1 %v2323_v9, %s2201_s17 }
 0x11c   : > { %v375_v10 = vpop.permute.xlu0 %374  ;;  %v367_v11 = vpop.permute.xlu1 %366 }
 0x11d   : > { %v369_v12 = vsel %vm359_vm3, 0.0, %v367_v11 }
 0x11e   : > { %v2057_v13 = vpack.i.bf16 %v375_v10, %v369_v12 }
 0x120   : > { %v385_v15 = vpop.permute.xlu0 %384  ;;  %2058 = vrot.lane.b32.xlu1 %v2057_v13, %s2192_s30  ;;  %v377_v16 = vpop.permute.xlu1 %376 }
 0x121   : > { %v379_v17 = vsel %vm359_vm3, 0.0, %v377_v16 }
 0x122   : > { %v2062_v18 = vpack.i.bf16 %v385_v15, %v379_v17 }
 0x124   : > { %v395_v19 = vpop.permute.xlu0 %394  ;;  %2063 = vrot.lane.b32.xlu0 %v2062_v18, %s2194_s10  ;;  %v387_v20 = vpop.permute.xlu1 %386 }
 0x125   : > { %v389_v22 = vsel %vm359_vm3, 0.0, %v387_v20 }
 0x126   : > { %v2067_v23 = vpack.i.bf16 %v395_v19, %v389_v22  ;;  %v354_v19 = vld [vmem:[%s2712_s4] sm:$0xff] }
 0x128   : > { %v381_v25 = vpop.permute.xlu0 %380  ;;  %361 = vrot.lane.b32.xlu0 %v2323_v9, %s2206_s18  ;;  %2068 = vrot.lane.b32.xlu1 %v2067_v23, %s2193_s9  ;;  %v371_v26 = vpop.permute.xlu1 %370 }
 0x129   : > { %v383_v27 = vsel %vm364_vm5, %v381_v25, 0.0  ;;  %v373_v28 = vsel %vm364_vm5, %v371_v26, 0.0 }
 0x12c   : > { %413 = vrot.lane.b32.xlu0 %v383_v27, %s2194_s10  ;;  %402 = vrot.lane.b32.xlu1 %v373_v28, %s2192_s30  ;;  %v391_v29 = vpop.permute.xlu1 %390  ;;  %v357_v32 = vpop.permute.xlu0 %356 }
 0x12d   : > { %v393_v31 = vsel %vm364_vm5, %v391_v29, 0.0  ;;  %v360_v39 = vsel %vm359_vm3, 0.0, %v357_v32 }
 0x130   : > { %424 = vrot.lane.b32.xlu1 %v393_v31, %s2193_s9  ;;  %440 = vperm.xlu0 %2072, %v352_v30  }
 0x192   : > { %v2059_v33 = vpop.permute.xlu1 %2058 }
 0x193   : > { %v2061_v35 = vunpack.i.h.bf16 %v2059_v33  ;;  %v2060_v36 = vunpack.i.l.bf16 %v2059_v33 }
 0x195   : > { %v429_v44 = vsel %vm340_vm0, %v360_v39, %v2060_v36  ;;  %v430_v45 = vsel %vm340_vm0, %v2323_v9, %v2061_v35 }
 0x196   : > { %v2064_v34 = vpop.permute.xlu0 %2063 }
 0x197   : > { %v2066_v37 = vunpack.i.h.bf16 %v2064_v34  ;;  %v2065_v38 = vunpack.i.l.bf16 %v2064_v34 }
 0x199   : > { %v432_v46 = vsel %vm342_vm1, %v429_v44, %v2065_v38  ;;  %v433_v47 = vsel %vm342_vm1, %v430_v45, %v2066_v37 }
 0x19a   : > { %v362_v40 = vpop.permute.xlu0 %361  ;;  %v2069_v41 = vpop.permute.xlu1 %2068 }
 0x19b   : > { %v2071_v42 = vunpack.i.h.bf16 %v2069_v41  ;;  %v2070_v43 = vunpack.i.l.bf16 %v2069_v41  ;;  %v365_v50 = vsel %vm364_vm5, %v362_v40, 0.0 }
 0x19d   : > { %v435_v48 = vsel %vm344_vm2, %v432_v46, %v2070_v43  ;;  %v436_v49 = vsel %vm344_vm2, %v433_v47, %v2071_v42  ;;  %v353_v47 = vld [vmem:[#allocation2] sm:$0xff] }
 0x19e   : > { %v403_v51 = vpop.permute.xlu1 %402  ;;  %v1972_v52 = vpack.c.bf16 %v436_v49, %v435_v48  ;;  %v414_v53 = vpop.permute.xlu0 %413 }
 0x19f   : > { %v431_v54 = vsel %vm340_vm0, %v365_v50, %v403_v51 }
 0x1a0   : > { %1973 = vmatpush3.bf16.msra.mxu0 %v1972_v52  ;;  %v434_v56 = vsel %vm342_vm1, %v431_v54, %v414_v53 }
 0x1a1   : > { %1883 = vmatprep.subr.mxu0 %v2204_v21 }
 0x1a2   : > { %v425_v55 = vpop.permute.xlu1 %424 }
 0x1a3   : > { %v437_v58 = vsel %vm344_vm2, %v434_v56, %v425_v55 }
 0x1a4   : > { %1884 = vmatpush3.msra.mxu0 %v437_v58 }
 0x1a5   : > { %1886 = vmatmul.mubr.msk.f32.vlgmr.msra.gmra.mrb[0].mxu0 %vm443_vm6, %v351_v57  ;;  %1977 = vmatprep.subr.bf16.mxu0 %v2202_v14 }
 0x1a6   : > { %1903 = vmatprep.mubr.msk.f32.mxu0 %vm2203_vm4, %v2204_v21 }
 0x1af   : > { %v441_v59 = vpop.permute.xlu0 %440 }
 0x278   : > { %v513_v60 = vpop.f32.mrb[0].mxu0 }
 0x279   : > { %v514_v61 = vadd.f32 %v513_v60, %v441_v59  ;;  %v1887_v62 = vpop.f32.mrb[1].mxu0 }
 0x27b   : > { %v517_v63 = vmax.f32 %v514_v61, 0.0 }
 0x27d   : > { %537 = vrot.lane.b32.xlu0 %v517_v63, %s2196_s12  ;;  %527 = vrot.lane.b32.xlu1 %v517_v63, %s2195_s11  ;;  %s2210_s11 = smov 62   ;;  %s2211_s12 = smov 94  }
 0x281   : > { %547 = vrot.lane.b32.xlu0 %v517_v63, %s2197_s13  ;;  %535 = vrot.lane.b32.xlu1 %v517_v63, %s2193_s9  ;;  %s2212_s13 = smov 2  }
 0x285   : > { %531 = vrot.lane.b32.xlu0 %v517_v63, %s2199_s15  ;;  %545 = vrot.lane.b32.xlu1 %v517_v63, %s2194_s10  ;;  %s2214_s15 = smov 126  }
 0x289   : > { %551 = vrot.lane.b32.xlu0 %v517_v63, %s2201_s17  ;;  %555 = vrot.lane.b32.xlu1 %v517_v63, %s2192_s30  ;;  %s2215_s17 = smov 100  }
 0x28d   : > { %541 = vrot.lane.b32.xlu1 %v517_v63, %s2198_s14  ;;  %s2213_s14 = smov 30  }
 0x291   : > { %519 = vrot.lane.b32.xlu1 %v517_v63, %s2200_s16 }
 0x2ef   : > { %v528_v0 = vpop.permute.xlu1 %527  ;;  %v538_v1 = vpop.permute.xlu0 %537 }
 0x2f0   : > { %v530_v2 = vsel %vm359_vm3, 0.0, %v528_v0  ;;  %v540_v6 = vsel %vm359_vm3, 0.0, %v538_v1 }
 0x2f3   : > { %v536_v3 = vpop.permute.xlu1 %535  ;;  %v548_v5 = vpop.permute.xlu0 %547 }
 0x2f4   : > { %v2073_v4 = vpack.i.bf16 %v536_v3, %v530_v2  ;;  %v550_v10 = vsel %vm359_vm3, 0.0, %v548_v5 }
 0x2f6   : > { %2074 = vrot.lane.b32.xlu0 %v2073_v4, %s2192_s30 }
 0x2f7   : > { %v546_v7 = vpop.permute.xlu1 %545  ;;  %v532_v12 = vpop.permute.xlu0 %531 }
 0x2f8   : > { %v2078_v8 = vpack.i.bf16 %v546_v7, %v540_v6  ;;  %v534_v17 = vsel %vm364_vm5, %v532_v12, 0.0 }
 0x2fa   : > { %2079 = vrot.lane.b32.xlu1 %v2078_v8, %s2194_s10  ;;  %v1812_v8 = vld [vmem:[%s2710_s2 + $0x8] sm:$0xff] }
 0x2fb   : > { %v556_v11 = vpop.permute.xlu1 %555  ;;  %v552_v18 = vpop.permute.xlu0 %551 }
 0x2fc   : > { %v2083_v13 = vpack.i.bf16 %v556_v11, %v550_v10  ;;  %v554_v20 = vsel %vm364_vm5, %v552_v18, 0.0 }
 0x2fe   : > { %523 = vrot.lane.b32.xlu1 %v517_v63, %s2206_s18  ;;  %2084 = vrot.lane.b32.xlu0 %v2083_v13, %s2193_s9  ;;  %s2216_s18 = smov 68  }
 0x2ff   : > { %v542_v15 = vpop.permute.xlu1 %541 }
 0x300   : > { %v544_v16 = vsel %vm364_vm5, %v542_v15, 0.0 }
 0x302   : > { %563 = vrot.lane.b32.xlu0 %v534_v17, %s2192_s30  ;;  %574 = vrot.lane.b32.xlu1 %v544_v16, %s2194_s10 }
 0x303   : > { %v520_v22 = vpop.permute.xlu1 %519 }
 0x304   : > { %v522_v29 = vsel %vm359_vm3, 0.0, %v520_v22 }
 0x306   : > { %585 = vrot.lane.b32.xlu0 %v554_v20, %s2193_s9  ;;  %601 = vperm.xlu1 %2088, %v354_v19  }
 0x368   : > { %v2075_v23 = vpop.permute.xlu0 %2074 }
 0x369   : > { %v2077_v25 = vunpack.i.h.bf16 %v2075_v23  ;;  %v2076_v26 = vunpack.i.l.bf16 %v2075_v23 }
 0x36b   : > { %v591_v32 = vsel %vm340_vm0, %v517_v63, %v2077_v25  ;;  %v590_v33 = vsel %vm340_vm0, %v522_v29, %v2076_v26 }
 0x36c   : > { %v2080_v24 = vpop.permute.xlu1 %2079 }
 0x36d   : > { %v2082_v27 = vunpack.i.h.bf16 %v2080_v24  ;;  %v2081_v28 = vunpack.i.l.bf16 %v2080_v24 }
 0x36f   : > { %v593_v36 = vsel %vm342_vm1, %v590_v33, %v2081_v28  ;;  %v594_v37 = vsel %vm342_vm1, %v591_v32, %v2082_v27 }
 0x370   : > { %v2085_v30 = vpop.permute.xlu0 %2084  ;;  %v524_v31 = vpop.permute.xlu1 %523 }
 0x371   : > { %v2087_v34 = vunpack.i.h.bf16 %v2085_v30  ;;  %v2086_v35 = vunpack.i.l.bf16 %v2085_v30  ;;  %v526_v40 = vsel %vm364_vm5, %v524_v31, 0.0 }
 0x373   : > { %v596_v38 = vsel %vm344_vm2, %v593_v36, %v2086_v35  ;;  %v597_v39 = vsel %vm344_vm2, %v594_v37, %v2087_v34 }
 0x374   : > { %v564_v41 = vpop.permute.xlu0 %563  ;;  %v1975_v42 = vpack.c.bf16 %v597_v39, %v596_v38  ;;  %v575_v44 = vpop.permute.xlu1 %574  ;;  %v1811_v38 = vld [vmem:[%s2709_s1 + $0x8] sm:$0xff] }
 0x375   : > { %v592_v43 = vsel %vm340_vm0, %v526_v40, %v564_v41 }
 0x376   : > { %1976 = vmatpush3.bf16.msra.mxu1 %v1975_v42  ;;  %v595_v45 = vsel %vm342_vm1, %v592_v43, %v575_v44 }
 0x377   : > { %1892 = vmatprep.subr.mxu1 %v2204_v21 }
 0x378   : > { %v586_v46 = vpop.permute.xlu0 %585 }
 0x379   : > { %v598_v48 = vsel %vm344_vm2, %v595_v45, %v586_v46 }
 0x37a   : > { %1893 = vmatpush3.msra.mxu1 %v598_v48 }
 0x37b   : > { %1895 = vmatmul.mubr.msk.f32.vlgmr.msra.gmra.mrb[0].mxu1 %vm443_vm6, %v353_v47  ;;  %1980 = vmatprep.subr.bf16.mxu1 %v2202_v14 }
 0x37c   : > { %1912 = vmatprep.mubr.msk.f32.mxu1 %vm2203_vm4, %v2204_v21 }
 0x385   : > { %v602_v49 = vpop.permute.xlu1 %601 }
 0x44e   : > { %v673_v50 = vpop.f32.mrb[0].mxu1 }
 0x44f   : > { %v674_v51 = vadd.f32 %v673_v50, %v602_v49  ;;  %v1896_v52 = vpop.f32.mrb[1].mxu1 }
 0x451   : > { %v677_v53 = vmax.f32 %v674_v51, 0.0 }
 0x453   : > { %v678_v54 = vadd.f32 %v677_v53, %v2323_v9 }
 0x455   : > { %v2431_v55 = vmax.f32 %v678_v54, 0.0 }
 0x457   : > { %707 = vrot.lane.b32.xlu1 %v2431_v55, %s2193_s9  ;;  %699 = vrot.lane.b32.xlu0 %v2431_v55, %s2207_s25 }
 0x45b   : > { %717 = vrot.lane.b32.xlu1 %v2431_v55, %s2194_s10  ;;  %709 = vrot.lane.b32.xlu0 %v2431_v55, %s2208_s26 }
 0x45f   : > { %727 = vrot.lane.b32.xlu1 %v2431_v55, %s2192_s30  ;;  %719 = vrot.lane.b32.xlu0 %v2431_v55, %s2209_s29 }
 0x463   : > { %713 = vrot.lane.b32.xlu1 %v2431_v55, %s2210_s11  ;;  %703 = vrot.lane.b32.xlu0 %v2431_v55, %s2211_s12 }
 0x467   : > { %689 = vrot.lane.b32.xlu1 %v2431_v55, %s2212_s13  ;;  %723 = vrot.lane.b32.xlu0 %v2431_v55, %s2213_s14 }
 0x4c9   : > { %v708_v9 = vpop.permute.xlu1 %707  ;;  %v700_v56 = vpop.permute.xlu0 %699 }
 0x4ca   : > { %v702_v57 = vsel %vm692_vm7, 0.0, %v700_v56 }
 0x4cb   : > { %v2089_v58 = vpack.i.bf16 %v708_v9, %v702_v57 }
 0x4cd   : > { %v718_v59 = vpop.permute.xlu1 %717  ;;  %2090 = vrot.lane.b32.xlu0 %v2089_v58, %s2192_s30  ;;  %v710_v60 = vpop.permute.xlu0 %709 }
 0x4ce   : > { %v712_v61 = vsel %vm692_vm7, 0.0, %v710_v60 }
 0x4cf   : > { %v2094_v62 = vpack.i.bf16 %v718_v59, %v712_v61 }
 0x4d1   : > { %v728_v63 = vpop.permute.xlu1 %727  ;;  %2095 = vrot.lane.b32.xlu1 %v2094_v62, %s2194_s10  ;;  %v720_v0 = vpop.permute.xlu0 %719  ;;  %v1813_v62 = vld [vmem:[%s2712_s4 + $0x8] sm:$0xff] }
 0x4d2   : > { %v722_v1 = vsel %vm692_vm7, 0.0, %v720_v0 }
 0x4d3   : > { %v2099_v2 = vpack.i.bf16 %v728_v63, %v722_v1 }
 0x4d5   : > { %v714_v3 = vpop.permute.xlu1 %713  ;;  %694 = vrot.lane.b32.xlu1 %v2431_v55, %s2214_s15  ;;  %2100 = vrot.lane.b32.xlu0 %v2099_v2, %s2193_s9  ;;  %v704_v4 = vpop.permute.xlu0 %703 }
 0x4d6   : > { %v716_v5 = vsel %vm697_vm8, %v714_v3, 0.0  ;;  %v706_v6 = vsel %vm697_vm8, %v704_v4, 0.0 }
 0x4d9   : > { %746 = vrot.lane.b32.xlu1 %v716_v5, %s2194_s10  ;;  %735 = vrot.lane.b32.xlu0 %v706_v6, %s2192_s30  ;;  %v724_v7 = vpop.permute.xlu0 %723  ;;  %v690_v11 = vpop.permute.xlu1 %689 }
 0x4da   : > { %v726_v10 = vsel %vm697_vm8, %v724_v7, 0.0  ;;  %v693_v19 = vsel %vm692_vm7, 0.0, %v690_v11 }
 0x4dd   : > { %773 = vperm.xlu1 %2088, %v1812_v8   ;;  %757 = vrot.lane.b32.xlu0 %v726_v10, %s2193_s9 }
 0x53f   : > { %v2091_v12 = vpop.permute.xlu0 %2090 }
 0x540   : > { %v2093_v15 = vunpack.i.h.bf16 %v2091_v12  ;;  %v2092_v16 = vunpack.i.l.bf16 %v2091_v12 }
 0x542   : > { %v763_v23 = vsel %vm340_vm0, %v2431_v55, %v2093_v15  ;;  %v762_v24 = vsel %vm340_vm0, %v693_v19, %v2092_v16 }
 0x543   : > { %v2096_v13 = vpop.permute.xlu1 %2095 }
 0x544   : > { %v2098_v17 = vunpack.i.h.bf16 %v2096_v13  ;;  %v2097_v18 = vunpack.i.l.bf16 %v2096_v13 }
 0x546   : > { %v765_v27 = vsel %vm342_vm1, %v762_v24, %v2097_v18  ;;  %v766_v28 = vsel %vm342_vm1, %v763_v23, %v2098_v17 }
 0x547   : > { %v695_v20 = vpop.permute.xlu1 %694  ;;  %v2101_v22 = vpop.permute.xlu0 %2100 }
 0x548   : > { %v2103_v25 = vunpack.i.h.bf16 %v2101_v22  ;;  %v2102_v26 = vunpack.i.l.bf16 %v2101_v22  ;;  %v698_v31 = vsel %vm697_vm8, %v695_v20, 0.0 }
 0x54a   : > { %v768_v29 = vsel %vm344_vm2, %v765_v27, %v2102_v26  ;;  %v769_v30 = vsel %vm344_vm2, %v766_v28, %v2103_v25  ;;  %v685_v28 = vld [vmem:[#allocation2 + $0x8] sm:$0xff] }
 0x54b   : > { %v1978_v32 = vpack.c.bf16 %v769_v30, %v768_v29  ;;  %v736_v33 = vpop.permute.xlu0 %735  ;;  %v747_v34 = vpop.permute.xlu1 %746  ;;  %v346_v30 = vld [vmem:[%s2713_s5] sm:$0xff] }
 0x54c   : > { %v764_v35 = vsel %vm340_vm0, %v698_v31, %v736_v33  ;;  %v347_v31 = vld [vmem:[%s2713_s5 + $0x8] sm:$0xff] }
 0x54d   : > { %1979 = vmatpush3.bf16.msra.mxu0 %v1978_v32  ;;  %v767_v36 = vsel %vm342_vm1, %v764_v35, %v747_v34  ;;  %v348_v32 = vld [vmem:[%s2713_s5 + $0x10] sm:$0xff]  ;;  %v2538_v33 = vpack.c.bf16 %v347_v31, %v346_v30  ;;  %v349_v34 = vld [vmem:[%s2713_s5 + $0x18] sm:$0xff] }
 0x54e   : > { %1901 = vmatprep.subr.mxu0 %v2204_v21  ;;  %v2543_v35 = vpack.c.bf16 %v349_v34, %v348_v32 }
 0x54f   : > { %v758_v37 = vpop.permute.xlu0 %757 }
 0x550   : > { %v770_v39 = vsel %vm344_vm2, %v767_v36, %v758_v37 }
 0x551   : > { %1902 = vmatpush3.msra.mxu0 %v770_v39 }
 0x552   : > { %1904 = vmatmul.mubr.msk.f32.vlgmr.msra.gmra.mrb[2].mxu0 %vm443_vm6, %v1811_v38  ;;  %1984 = vmatprep.subr.bf16.mxu0 %v2538_v33 }
 0x553   : > { %1986 = vmatpush3.bf16.msra.mxu0 %v2538_v33 }
 0x554   : > { %1988 = vmatprep.subr.bf16.mxu0 %v2543_v35 }
 0x557   : > { %1990 = vmatpush3.bf16.msra.mxu0 %v2543_v35 }
 0x558   : > { %1994 = vmatprep.subr.bf16.mxu0 %v2202_v14 }
 0x55c   : > { %v774_v40 = vpop.permute.xlu1 %773 }
 0x625   : > { %v845_v41 = vpop.f32.mrb[2].mxu0 }
 0x626   : > { %v846_v42 = vadd.f32 %v845_v41, %v774_v40  ;;  %v1905_v43 = vpop.f32.mrb[3].mxu0 }
 0x628   : > { %v849_v44 = vmax.f32 %v846_v42, 0.0 }
 0x62a   : > { %867 = vrot.lane.b32.xlu1 %v849_v44, %s2193_s9  ;;  %859 = vrot.lane.b32.xlu0 %v849_v44, %s2207_s25 }
 0x62e   : > { %877 = vrot.lane.b32.xlu1 %v849_v44, %s2194_s10  ;;  %869 = vrot.lane.b32.xlu0 %v849_v44, %s2208_s26 }
 0x632   : > { %887 = vrot.lane.b32.xlu1 %v849_v44, %s2192_s30  ;;  %879 = vrot.lane.b32.xlu0 %v849_v44, %s2209_s29 }
 0x636   : > { %873 = vrot.lane.b32.xlu1 %v849_v44, %s2210_s11  ;;  %863 = vrot.lane.b32.xlu0 %v849_v44, %s2211_s12 }
 0x63a   : > { %851 = vrot.lane.b32.xlu1 %v849_v44, %s2212_s13  ;;  %883 = vrot.lane.b32.xlu0 %v849_v44, %s2213_s14 }
 0x69c   : > { %v868_v45 = vpop.permute.xlu1 %867  ;;  %v860_v46 = vpop.permute.xlu0 %859 }
 0x69d   : > { %v862_v47 = vsel %vm692_vm7, 0.0, %v860_v46 }
 0x69e   : > { %v2104_v48 = vpack.i.bf16 %v868_v45, %v862_v47 }
 0x6a0   : > { %v878_v49 = vpop.permute.xlu1 %877  ;;  %2105 = vrot.lane.b32.xlu0 %v2104_v48, %s2192_s30  ;;  %v870_v50 = vpop.permute.xlu0 %869 }
 0x6a1   : > { %v872_v51 = vsel %vm692_vm7, 0.0, %v870_v50 }
 0x6a2   : > { %v2109_v52 = vpack.i.bf16 %v878_v49, %v872_v51 }
 0x6a4   : > { %v888_v53 = vpop.permute.xlu1 %887  ;;  %2110 = vrot.lane.b32.xlu1 %v2109_v52, %s2194_s10  ;;  %v880_v54 = vpop.permute.xlu0 %879 }
 0x6a5   : > { %v882_v9 = vsel %vm692_vm7, 0.0, %v880_v54  ;;  %v1127_v54 = vld [vmem:[%s2715_s7] sm:$0xff] }
 0x6a6   : > { %v2114_v56 = vpack.i.bf16 %v888_v53, %v882_v9 }
 0x6a8   : > { %v874_v57 = vpop.permute.xlu1 %873  ;;  %855 = vrot.lane.b32.xlu1 %v849_v44, %s2214_s15  ;;  %2115 = vrot.lane.b32.xlu0 %v2114_v56, %s2193_s9  ;;  %v864_v58 = vpop.permute.xlu0 %863  ;;  %v2576_v56 = vld [vmem:[%s2714_s6] ss:$0 sm:$0xff] }
 0x6a9   : > { %v876_v59 = vsel %vm697_vm8, %v874_v57, 0.0  ;;  %v866_v60 = vsel %vm697_vm8, %v864_v58, 0.0 }
 0x6ac   : > { %906 = vrot.lane.b32.xlu1 %v876_v59, %s2194_s10  ;;  %895 = vrot.lane.b32.xlu0 %v866_v60, %s2192_s30  ;;  %v884_v61 = vpop.permute.xlu0 %883  ;;  %v852_v0 = vpop.permute.xlu1 %851 }
 0x6ad   : > { %v886_v63 = vsel %vm697_vm8, %v884_v61, 0.0  ;;  %v854_v7 = vsel %vm692_vm7, 0.0, %v852_v0 }
 0x6b0   : > { %933 = vperm.xlu1 %2088, %v1813_v62   ;;  %917 = vrot.lane.b32.xlu0 %v886_v63, %s2193_s9 }
 0x712   : > { %v2106_v1 = vpop.permute.xlu0 %2105 }
 0x713   : > { %v2108_v3 = vunpack.i.h.bf16 %v2106_v1  ;;  %v2107_v4 = vunpack.i.l.bf16 %v2106_v1 }
 0x715   : > { %v923_v11 = vsel %vm340_vm0, %v849_v44, %v2108_v3  ;;  %v922_v12 = vsel %vm340_vm0, %v854_v7, %v2107_v4 }
 0x716   : > { %v2111_v2 = vpop.permute.xlu1 %2110 }
 0x717   : > { %v2113_v5 = vunpack.i.h.bf16 %v2111_v2  ;;  %v2112_v6 = vunpack.i.l.bf16 %v2111_v2 }
 0x719   : > { %v925_v16 = vsel %vm342_vm1, %v922_v12, %v2112_v6  ;;  %v926_v17 = vsel %vm342_vm1, %v923_v11, %v2113_v5 }
 0x71a   : > { %v856_v8 = vpop.permute.xlu1 %855  ;;  %v2116_v10 = vpop.permute.xlu0 %2115 }
 0x71b   : > { %v2118_v13 = vunpack.i.h.bf16 %v2116_v10  ;;  %v2117_v15 = vunpack.i.l.bf16 %v2116_v10  ;;  %v858_v20 = vsel %vm697_vm8, %v856_v8, 0.0 }
 0x71d   : > { %v928_v18 = vsel %vm344_vm2, %v925_v16, %v2117_v15  ;;  %v929_v19 = vsel %vm344_vm2, %v926_v17, %v2118_v13  ;;  %v1823_v13 = vld [vmem:[%s2710_s2 + $0x10] sm:$0xff] }
 0x71e   : > { %v1981_v22 = vpack.c.bf16 %v929_v19, %v928_v18  ;;  %v896_v23 = vpop.permute.xlu0 %895  ;;  %v907_v24 = vpop.permute.xlu1 %906 }
 0x71f   : > { %v924_v25 = vsel %vm340_vm0, %v858_v20, %v896_v23 }
 0x720   : > { %1982 = vmatpush3.bf16.msra.mxu1 %v1981_v22  ;;  %v927_v26 = vsel %vm342_vm1, %v924_v25, %v907_v24 }
 0x721   : > { %1910 = vmatprep.subr.mxu1 %v2204_v21 }
 0x722   : > { %v918_v27 = vpop.permute.xlu0 %917 }
 0x723   : > { %v930_v29 = vsel %vm344_vm2, %v927_v26, %v918_v27 }
 0x724   : > { %1911 = vmatpush3.msra.mxu1 %v930_v29 }
 0x725   : > { %1913 = vmatmul.mubr.msk.f32.vlgmr.msra.gmra.mrb[2].mxu1 %vm443_vm6, %v685_v28  ;;  %1929 = vmatprep.subr.mxu1 %v2204_v21 }
 0x726   : > { %1931 = vmatprep.mubr.msk.f32.mxu1 %vm2203_vm4, %v2204_v21 }
 0x72f   : > { %v934_v36 = vpop.permute.xlu1 %933 }
 0x7f8   : > { %v1005_v37 = vpop.f32.mrb[2].mxu1 }
 0x7f9   : > { %v1006_v38 = vadd.f32 %v1005_v37, %v934_v36  ;;  %v1914_v39 = vpop.f32.mrb[3].mxu1 }
 0x7fb   : > { %v1009_v40 = vmax.f32 %v1006_v38, 0.0 }
 0x7fd   : > { %v1010_v41 = vadd.f32 %v1009_v40, %v2431_v55 }
 0x7ff   : > { %v1011_v42 = vmax.f32 %v1010_v41, 0.0 }
 0x801   : > { %1015 = vrot.lane.b32.xlu1 %v1011_v42, %s2194_s10  ;;  %1013 = vrot.lane.b32.xlu0 %v1011_v42, %s2193_s9 }
 0x802   : > { %1923 = vmatprep.mubr.msk.f32.mxu0 %vm340_vm0, %v1011_v42 }
 0x805   : > { %1017 = vrot.lane.b32.xlu0 %v1011_v42, %s2192_s30 }
 0x873   : > { %v1016_v43 = vpop.permute.xlu1 %1015  ;;  %v1014_v44 = vpop.permute.xlu0 %1013 }
 0x874   : > { %1924 = vmatmul.mubr.msk.f32.vlgmr.msra.gmra.mrb[4].mxu0 %vm340_vm0, %v1014_v44  ;;  %v1822_v44 = vld [vmem:[%s2709_s1 + $0x10] sm:$0xff] }
 0x875   : > { %1926 = vmatprep.mubr.msk.f32.mxu0 %vm340_vm0, %v1016_v43 }
 0x877   : > { %v1018_v45 = vpop.permute.xlu0 %1017 }
 0x878   : > { %1927 = vmatmul.mubr.msk.f32.gmra.mrb[6].mxu0 %vm340_vm0, %v1018_v45 }
 0x879   : > { %1949 = vmatprep.mubr.msk.f32.mxu0 %vm2203_vm4, %v2204_v21 }
 0x947   : > { %v1925_v55 = vpop.f32.mrb[4].mxu0 }
 0x948   : > { %1113 = vrot.lane.b32.xlu1 %v1925_v55, %s2192_s30  ;;  %v1093_v46 = vpop.f32.mrb[5].mxu0 }
 0x94b   : > { %v1928_v47 = vpop.f32.mrb[6].mxu0 }
 0x94c   : > { %1121 = vrot.lane.b32.xlu1 %v1928_v47, %s2193_s9  ;;  %v1103_v48 = vpop.f32.mrb[7].mxu0 }
 0x94d   : > { %1117 = vrot.lane.b32.xlu0 %v1103_v48, %s2194_s10 }
 0x9ba   : > { %v1114_v49 = vpop.permute.xlu1 %1113 }
 0x9bb   : > { %v1124_v50 = vsel %vm340_vm0, %v1093_v46, %v1114_v49 }
 0x9be   : > { %v1122_v52 = vpop.permute.xlu1 %1121 }
 0x9bf   : > { %v1118_v51 = vpop.permute.xlu0 %1117 }
 0x9c0   : > { %v1125_v53 = vsel %vm342_vm1, %v1124_v50, %v1118_v51 }
 0x9c1   : > { %v1126_v9 = vsel %vm344_vm2, %v1125_v53, %v1122_v52 }
 0x9c2   : > { %1930 = vmatpush3.msra.mxu1 %v1126_v9 }
 0x9c3   : > { %1932 = vmatmul.mubr.msk.f32.vlgmr.msra.gmra.mrb[4].mxu1 %vm1134_vm9, %v1127_v54  ;;  %1991 = vmatprep.subr.bf16.mxu1 %v2202_v14 }
 0x9c4   : > { %1940 = vmatprep.mubr.msk.f32.mxu1 %vm2203_vm4, %v2204_v21 }
 0xa96   : > { %v1204_v57 = vpop.f32.mrb[4].mxu1 }
 0xa97   : > { %v2579_v58 = vadd.f32 %v2576_v56, %v1204_v57  ;;  %v1933_v59 = vpop.f32.mrb[5].mxu1 }
 0xa99   : > { %1235 = vrot.lane.b32.xlu1 %v2579_v58, %s2193_s9  ;;  %1227 = vrot.lane.b32.xlu0 %v2579_v58, %s2215_s17 }
 0xa9d   : > { %1245 = vrot.lane.b32.xlu1 %v2579_v58, %s2194_s10  ;;  %1237 = vrot.lane.b32.xlu0 %v2579_v58, %s2216_s18 }
 0xaa1   : > { %1255 = vrot.lane.b32.xlu1 %v2579_v58, %s2192_s30  ;;  %1247 = vrot.lane.b32.xlu0 %v2579_v58, %s2217_s19 }
 0xaa5   : > { %1241 = vrot.lane.b32.xlu1 %v2579_v58, %s2218_s20  ;;  %1231 = vrot.lane.b32.xlu0 %v2579_v58, %s2219_s21 }
 0xaa9   : > { %1217 = vrot.lane.b32.xlu1 %v2579_v58, %s2220_s22  ;;  %1251 = vrot.lane.b32.xlu0 %v2579_v58, %s2221_s23 }
 0xb0b   : > { %v1236_v14 = vpop.permute.xlu1 %1235  ;;  %v1228_v60 = vpop.permute.xlu0 %1227 }
 0xb0c   : > { %v1230_v61 = vsel %vm1220_vm10, 0.0, %v1228_v60 }
 0xb0d   : > { %v2119_v62 = vpack.i.bf16 %v1236_v14, %v1230_v61 }
 0xb0f   : > { %v1246_v63 = vpop.permute.xlu1 %1245  ;;  %2120 = vrot.lane.b32.xlu0 %v2119_v62, %s2192_s30  ;;  %v1238_v0 = vpop.permute.xlu0 %1237 }
 0xb10   : > { %v1240_v1 = vsel %vm1220_vm10, 0.0, %v1238_v0 }
 0xb11   : > { %v2124_v2 = vpack.i.bf16 %v1246_v63, %v1240_v1 }
 0xb13   : > { %v1256_v3 = vpop.permute.xlu1 %1255  ;;  %2125 = vrot.lane.b32.xlu1 %v2124_v2, %s2194_s10  ;;  %v1248_v4 = vpop.permute.xlu0 %1247  ;;  %v1824_v2 = vld [vmem:[%s2712_s4 + $0x10] sm:$0xff] }
 0xb14   : > { %v1250_v5 = vsel %vm1220_vm10, 0.0, %v1248_v4 }
 0xb15   : > { %v2129_v6 = vpack.i.bf16 %v1256_v3, %v1250_v5 }
 0xb17   : > { %v1242_v7 = vpop.permute.xlu1 %1241  ;;  %1222 = vrot.lane.b32.xlu1 %v2579_v58, %s2222_s24  ;;  %2130 = vrot.lane.b32.xlu0 %v2129_v6, %s2193_s9  ;;  %v1232_v8 = vpop.permute.xlu0 %1231 }
 0xb18   : > { %v1244_v10 = vsel %vm1225_vm11, %v1242_v7, 0.0  ;;  %v1234_v11 = vsel %vm1225_vm11, %v1232_v8, 0.0 }
 0xb1b   : > { %1274 = vrot.lane.b32.xlu1 %v1244_v10, %s2194_s10  ;;  %1263 = vrot.lane.b32.xlu0 %v1234_v11, %s2192_s30  ;;  %v1252_v12 = vpop.permute.xlu0 %1251  ;;  %v1218_v16 = vpop.permute.xlu1 %1217 }
 0xb1c   : > { %v1254_v15 = vsel %vm1225_vm11, %v1252_v12, 0.0  ;;  %v1221_v24 = vsel %vm1220_vm10, 0.0, %v1218_v16 }
 0xb1f   : > { %1301 = vperm.xlu1 %2088, %v1823_v13   ;;  %1285 = vrot.lane.b32.xlu0 %v1254_v15, %s2193_s9 }
 0xb81   : > { %v2121_v17 = vpop.permute.xlu0 %2120 }
 0xb82   : > { %v2123_v19 = vunpack.i.h.bf16 %v2121_v17  ;;  %v2122_v20 = vunpack.i.l.bf16 %v2121_v17 }
 0xb84   : > { %v1291_v27 = vsel %vm340_vm0, %v2579_v58, %v2123_v19  ;;  %v1290_v28 = vsel %vm340_vm0, %v1221_v24, %v2122_v20 }
 0xb85   : > { %v2126_v18 = vpop.permute.xlu1 %2125 }
 0xb86   : > { %v2128_v22 = vunpack.i.h.bf16 %v2126_v18  ;;  %v2127_v23 = vunpack.i.l.bf16 %v2126_v18 }
 0xb88   : > { %v1293_v31 = vsel %vm342_vm1, %v1290_v28, %v2127_v23  ;;  %v1294_v32 = vsel %vm342_vm1, %v1291_v27, %v2128_v22 }
 0xb89   : > { %v1223_v25 = vpop.permute.xlu1 %1222  ;;  %v2131_v26 = vpop.permute.xlu0 %2130 }
 0xb8a   : > { %v2133_v29 = vunpack.i.h.bf16 %v2131_v26  ;;  %v2132_v30 = vunpack.i.l.bf16 %v2131_v26  ;;  %v1226_v37 = vsel %vm1225_vm11, %v1223_v25, 0.0 }
 0xb8c   : > { %v1296_v34 = vsel %vm344_vm2, %v1293_v31, %v2132_v30  ;;  %v1297_v36 = vsel %vm344_vm2, %v1294_v32, %v2133_v29  ;;  %v1213_v32 = vld [vmem:[#allocation2 + $0x10] sm:$0xff] }
 0xb8d   : > { %v1992_v38 = vpack.c.bf16 %v1297_v36, %v1296_v34  ;;  %v1264_v39 = vpop.permute.xlu0 %1263  ;;  %v1275_v40 = vpop.permute.xlu1 %1274 }
 0xb8e   : > { %v1292_v41 = vsel %vm340_vm0, %v1226_v37, %v1264_v39 }
 0xb8f   : > { %1993 = vmatpush3.bf16.msra.mxu1 %v1992_v38  ;;  %v1295_v42 = vsel %vm342_vm1, %v1292_v41, %v1275_v40 }
 0xb90   : > { %1938 = vmatprep.subr.mxu1 %v2204_v21 }
 0xb91   : > { %v1286_v43 = vpop.permute.xlu0 %1285 }
 0xb92   : > { %v1298_v45 = vsel %vm344_vm2, %v1295_v42, %v1286_v43 }
 0xb93   : > { %1939 = vmatpush3.msra.mxu1 %v1298_v45 }
 0xb94   : > { %1941 = vmatmul.mubr.msk.f32.vlgmr.msra.gmra.mrb[6].mxu1 %vm443_vm6, %v1822_v44  ;;  %1998 = vmatprep.subr.bf16.mxu1 %v2538_v33 }
 0xb95   : > { %2000 = vmatpush3.bf16.msra.mxu1 %v2538_v33 }
 0xb96   : > { %2002 = vmatprep.subr.bf16.mxu1 %v2543_v35 }
 0xb99   : > { %2004 = vmatpush3.bf16.msra.mxu1 %v2543_v35 }
 0xb9e   : > { %v1302_v55 = vpop.permute.xlu1 %1301 }
 0xc67   : > { %v1373_v46 = vpop.f32.mrb[6].mxu1 }
 0xc68   : > { %v1374_v47 = vadd.f32 %v1373_v46, %v1302_v55  ;;  %v1942_v48 = vpop.f32.mrb[7].mxu1 }
 0xc6a   : > { %v1377_v49 = vmax.f32 %v1374_v47, 0.0 }
 0xc6c   : > { %1395 = vrot.lane.b32.xlu1 %v1377_v49, %s2193_s9  ;;  %1387 = vrot.lane.b32.xlu0 %v1377_v49, %s2215_s17 }
 0xc70   : > { %1405 = vrot.lane.b32.xlu1 %v1377_v49, %s2194_s10  ;;  %1397 = vrot.lane.b32.xlu0 %v1377_v49, %s2216_s18 }
 0xc74   : > { %1415 = vrot.lane.b32.xlu1 %v1377_v49, %s2192_s30  ;;  %1407 = vrot.lane.b32.xlu0 %v1377_v49, %s2217_s19 }
 0xc78   : > { %1401 = vrot.lane.b32.xlu1 %v1377_v49, %s2218_s20  ;;  %1391 = vrot.lane.b32.xlu0 %v1377_v49, %s2219_s21 }
 0xc7c   : > { %1379 = vrot.lane.b32.xlu1 %v1377_v49, %s2220_s22  ;;  %1411 = vrot.lane.b32.xlu0 %v1377_v49, %s2221_s23 }
 0xcde   : > { %v1396_v33 = vpop.permute.xlu1 %1395  ;;  %v1388_v35 = vpop.permute.xlu0 %1387 }
 0xcdf   : > { %v1390_v50 = vsel %vm1220_vm10, 0.0, %v1388_v35 }
 0xce0   : > { %v2134_v51 = vpack.i.bf16 %v1396_v33, %v1390_v50  ;;  %v1831_v50 = vld [vmem:[%s2715_s7 + $0x8] sm:$0xff] }
 0xce2   : > { %v1406_v52 = vpop.permute.xlu1 %1405  ;;  %2135 = vrot.lane.b32.xlu0 %v2134_v51, %s2192_s30  ;;  %v1398_v53 = vpop.permute.xlu0 %1397 }
 0xce3   : > { %v1400_v54 = vsel %vm1220_vm10, 0.0, %v1398_v53 }
 0xce4   : > { %v2139_v9 = vpack.i.bf16 %v1406_v52, %v1400_v54 }
 0xce6   : > { %v1416_v57 = vpop.permute.xlu1 %1415  ;;  %2140 = vrot.lane.b32.xlu1 %v2139_v9, %s2194_s10  ;;  %v1408_v59 = vpop.permute.xlu0 %1407 }
 0xce7   : > { %v1410_v14 = vsel %vm1220_vm10, 0.0, %v1408_v59 }
 0xce8   : > { %v2144_v60 = vpack.i.bf16 %v1416_v57, %v1410_v14 }
 0xcea   : > { %v1402_v61 = vpop.permute.xlu1 %1401  ;;  %1383 = vrot.lane.b32.xlu1 %v1377_v49, %s2222_s24  ;;  %2145 = vrot.lane.b32.xlu0 %v2144_v60, %s2193_s9  ;;  %v1392_v62 = vpop.permute.xlu0 %1391 }
 0xceb   : > { %v1404_v63 = vsel %vm1225_vm11, %v1402_v61, 0.0  ;;  %v1394_v0 = vsel %vm1225_vm11, %v1392_v62, 0.0 }
 0xcee   : > { %1434 = vrot.lane.b32.xlu1 %v1404_v63, %s2194_s10  ;;  %1423 = vrot.lane.b32.xlu0 %v1394_v0, %s2192_s30  ;;  %v1412_v1 = vpop.permute.xlu0 %1411  ;;  %v1380_v4 = vpop.permute.xlu1 %1379 }
 0xcef   : > { %v1414_v3 = vsel %vm1225_vm11, %v1412_v1, 0.0  ;;  %v1382_v12 = vsel %vm1220_vm10, 0.0, %v1380_v4 }
 0xcf2   : > { %1461 = vperm.xlu1 %2088, %v1824_v2   ;;  %1445 = vrot.lane.b32.xlu0 %v1414_v3, %s2193_s9 }
 0xd54   : > { %v2136_v5 = vpop.permute.xlu0 %2135 }
 0xd55   : > { %v2138_v7 = vunpack.i.h.bf16 %v2136_v5  ;;  %v2137_v8 = vunpack.i.l.bf16 %v2136_v5 }
 0xd57   : > { %v1451_v16 = vsel %vm340_vm0, %v1377_v49, %v2138_v7  ;;  %v1450_v17 = vsel %vm340_vm0, %v1382_v12, %v2137_v8 }
 0xd58   : > { %v2141_v6 = vpop.permute.xlu1 %2140 }
 0xd59   : > { %v2143_v10 = vunpack.i.h.bf16 %v2141_v6  ;;  %v2142_v11 = vunpack.i.l.bf16 %v2141_v6 }
 0xd5b   : > { %v1453_v20 = vsel %vm342_vm1, %v1450_v17, %v2142_v11  ;;  %v1454_v22 = vsel %vm342_vm1, %v1451_v16, %v2143_v10 }
 0xd5c   : > { %v1384_v13 = vpop.permute.xlu1 %1383  ;;  %v2146_v15 = vpop.permute.xlu0 %2145 }
 0xd5d   : > { %v2148_v18 = vunpack.i.h.bf16 %v2146_v15  ;;  %v2147_v19 = vunpack.i.l.bf16 %v2146_v15  ;;  %v1386_v25 = vsel %vm1225_vm11, %v1384_v13, 0.0 }
 0xd5f   : > { %v1456_v23 = vsel %vm344_vm2, %v1453_v20, %v2147_v19  ;;  %v1457_v24 = vsel %vm344_vm2, %v1454_v22, %v2148_v18 }
 0xd60   : > { %v1995_v26 = vpack.c.bf16 %v1457_v24, %v1456_v23  ;;  %v1424_v27 = vpop.permute.xlu0 %1423  ;;  %v1435_v28 = vpop.permute.xlu1 %1434 }
 0xd61   : > { %v1452_v29 = vsel %vm340_vm0, %v1386_v25, %v1424_v27 }
 0xd62   : > { %1996 = vmatpush3.bf16.msra.mxu0 %v1995_v26  ;;  %v1455_v30 = vsel %vm342_vm1, %v1452_v29, %v1435_v28 }
 0xd63   : > { %1947 = vmatprep.subr.mxu0 %v2204_v21 }
 0xd64   : > { %v1446_v31 = vpop.permute.xlu0 %1445 }
 0xd65   : > { %v1458_v34 = vsel %vm344_vm2, %v1455_v30, %v1446_v31 }
 0xd66   : > { %1948 = vmatpush3.msra.mxu0 %v1458_v34 }
 0xd67   : > { %1950 = vmatmul.mubr.msk.f32.vlgmr.msra.gmra.mrb[8].mxu0 %vm443_vm6, %v1213_v32  ;;  %1966 = vmatprep.subr.mxu0 %v2204_v21 }
 0xd68   : > { %1968 = vmatprep.mubr.msk.f32.mxu0 %vm2203_vm4, %v2204_v21 }
 0xd71   : > { %v1462_v36 = vpop.permute.xlu1 %1461 }
 0xe3a   : > { %v1533_v37 = vpop.f32.mrb[8].mxu0 }
 0xe3b   : > { %v1534_v38 = vadd.f32 %v1533_v37, %v1462_v36  ;;  %v1951_v39 = vpop.f32.mrb[9].mxu0 }
 0xe3d   : > { %v1537_v40 = vmax.f32 %v1534_v38, 0.0 }
 0xe3f   : > { %v1538_v41 = vadd.f32 %v1537_v40, %v2579_v58 }
 0xe41   : > { %v1539_v42 = vmax.f32 %v1538_v41, 0.0 }
 0xe43   : > { %1543 = vrot.lane.b32.xlu1 %v1539_v42, %s2194_s10  ;;  %1541 = vrot.lane.b32.xlu0 %v1539_v42, %s2193_s9 }
 0xe44   : > { %1960 = vmatprep.mubr.msk.f32.mxu1 %vm340_vm0, %v1539_v42 }
 0xe47   : > { %1545 = vrot.lane.b32.xlu0 %v1539_v42, %s2192_s30 }
 0xeb5   : > { %v1544_v43 = vpop.permute.xlu1 %1543  ;;  %v1542_v44 = vpop.permute.xlu0 %1541 }
 0xeb6   : > { %1961 = vmatmul.mubr.msk.f32.vlgmr.msra.gmra.mrb[8].mxu1 %vm340_vm0, %v1542_v44 }
 0xeb7   : > { %1963 = vmatprep.mubr.msk.f32.mxu1 %vm340_vm0, %v1544_v43 }
 0xeb9   : > { %v1546_v21 = vpop.permute.xlu0 %1545 }
 0xeba   : > { %1964 = vmatmul.mubr.msk.f32.gmra.mrb[10].mxu1 %vm340_vm0, %v1546_v21 }
 0xf89   : > { %v1962_v45 = vpop.f32.mrb[8].mxu1 }
 0xf8a   : > { %1641 = vrot.lane.b32.xlu1 %v1962_v45, %s2192_s30  ;;  %v1621_v58 = vpop.f32.mrb[9].mxu1  ;;  %s1805_s30 = sshll.u32 %s2727_s28, 3 }
 0xf8b   : > { %s320_s16 = scalar_lea.vmem %s2716_s8, %s1805_s30 }
 0xf8d   : > { %v1965_v55 = vpop.f32.mrb[10].mxu1 }
 0xf8e   : > { %1649 = vrot.lane.b32.xlu1 %v1965_v55, %s2193_s9  ;;  %v1631_v46 = vpop.f32.mrb[11].mxu1 }
 0xf8f   : > { %1645 = vrot.lane.b32.xlu0 %v1631_v46, %s2194_s10 }
 0xffc   : > { %v1642_v47 = vpop.permute.xlu1 %1641 }
 0xffd   : > { %v1652_v48 = vsel %vm340_vm0, %v1621_v58, %v1642_v47 }
0x1000   : > { %v1650_v33 = vpop.permute.xlu1 %1649 }
0x1001   : > { %v1646_v49 = vpop.permute.xlu0 %1645 }
0x1002   : > { %v1653_v35 = vsel %vm342_vm1, %v1652_v48, %v1646_v49 }
0x1003   : > { %v1654_v51 = vsel %vm344_vm2, %v1653_v35, %v1650_v33 }
0x1004   : > { %1967 = vmatpush3.msra.mxu0 %v1654_v51 }
0x1005   : > { %1969 = vmatmul.mubr.msk.f32.vlgmr.msra.gmra.mrb[10].mxu0 %vm1134_vm9, %v1831_v50 }
0x10d8   : > { %v1726_v52 = vpop.f32.mrb[10].mxu0 }
0x10d9   : > { %v1727_v53 = vadd.f32 %v2576_v56, %v1726_v52  ;;  %v1970_v54 = vpop.f32.mrb[11].mxu0 }
0x10db   : > { %1730 = vst [vmem:[%s320_s16] sm:$0xff] %v1727_v53 }
0x10dc PF: > { %s19_s27 = sadd.s32 1, %s2187_s27  }
0x10dd   : > { %p16_p5 = scmp.ge.s32.totalorder %s19_s27, 6  }
0x10df   :  { %18 = sbr.rel (!%p16_p5) target bundleno = 1 (0x1), region = 99 }
0x10e6   :  { %1750 = vsyncpa [#allocation3], 1 }
0x10e7   :  { %1752 = vsyncpa [#allocation3 + $0x1], 1 }

</bundles_post_ra>
